<compile_context>
chip_gen: v6e
topology: v6e:2x2x1
jax: 0.10.0
libtpu: 0.0.40
codegen_flags: <defaults>
</compile_context>

<pallas_src>
import jax
import jax.numpy as jnp
from jax.experimental import pallas as pl
from jax.experimental.pallas import tpu as pltpu

LANE = 128
SUBLANE = 8


def _round_up(n, m):
    return ((n + m - 1) // m) * m


def _pad2(a, rows, cols):
    r, c = a.shape
    return jnp.pad(a, ((0, rows - r), (0, cols - c)))


# ---------------------------------------------------------------------------
# Kernel
# ---------------------------------------------------------------------------
def contrastive_kernel(x_ref,
                       w1_ref, b1_ref,
                       w2_ref, b2_ref,
                       w3_ref, b3_ref,
                       w4_ref, b4_ref,
                       out_ref):
    """One batch tile: 4 chained bf16 MXU matmuls with f32 accumulation.

    x_ref : (TB, in_p)  bf16        w*_ref : (K_p, N_p) bf16
    b*_ref: (1, N_p)    f32         out_ref: (TB, proj_p) out_dtype
    (all feature dims padded to multiples of 128 once, at parameter-prep time)
    """
    x = x_ref[...]                                               # already bf16
    # --- feature_model ---
    h = jnp.dot(x, w1_ref[...], preferred_element_type=jnp.float32) + b1_ref[...]
    h = jnp.maximum(h, 0.0)                                      # ReLU in f32 (VPU)
    f = jnp.dot(h.astype(jnp.bfloat16), w2_ref[...],
                preferred_element_type=jnp.float32) + b2_ref[...]
    # --- projection_model ---
    p = jnp.dot(f.astype(jnp.bfloat16), w3_ref[...],
                preferred_element_type=jnp.float32) + b3_ref[...]
    p = jnp.maximum(p, 0.0)                                      # ReLU in f32 (VPU)
    o = jnp.dot(p.astype(jnp.bfloat16), w4_ref[...],
                preferred_element_type=jnp.float32) + b4_ref[...]
    out_ref[...] = o.astype(out_ref.dtype)


# ---------------------------------------------------------------------------
# One-time parameter preparation (hoisted out of the per-call forward)
# ---------------------------------------------------------------------------
def prepare_params(params):
    """Pad every K/N dim to a multiple of 128 and cast weights to bf16, once.

    Zero padding is exact: padded input columns hit zero weight rows, padded
    activation columns carry zero bias and stay zero through the ReLUs.
    Biases stay f32 (added post-accumulation).
    """
    in_dim, hid1 = params["w1"].shape
    feat = params["w2"].shape[1]
    hid2 = params["w3"].shape[1]
    proj = params["w4"].shape[1]

    in_p = _round_up(in_dim, LANE)
    h1_p = _round_up(hid1, LANE)
    ft_p = _round_up(feat, LANE)
    h2_p = _round_up(hid2, LANE)
    pr_p = _round_up(proj, LANE)

    w1 = _pad2(params["w1"], in_p, h1_p).astype(jnp.bfloat16)
    b1 = _pad2(params["b1"], 1, h1_p).astype(jnp.float32)
    w2 = _pad2(params["w2"], h1_p, ft_p).astype(jnp.bfloat16)
    b2 = _pad2(params["b2"], 1, ft_p).astype(jnp.float32)
    w3 = _pad2(params["w3"], ft_p, h2_p).astype(jnp.bfloat16)
    b3 = _pad2(params["b3"], 1, h2_p).astype(jnp.float32)
    w4 = _pad2(params["w4"], h2_p, pr_p).astype(jnp.bfloat16)
    b4 = _pad2(params["b4"], 1, pr_p).astype(jnp.float32)

    weights = (w1, b1, w2, b2, w3, b3, w4, b4)
    dims = dict(in_dim=in_dim, proj=proj,
                in_p=in_p, h1_p=h1_p, ft_p=ft_p, h2_p=h2_p, pr_p=pr_p)
    return weights, dims


def _device_budget():
    """(vmem_limit_bytes, default batch tile) per TPU generation."""
    try:
        vmem_cap = int(pltpu.get_tpu_info().vmem_capacity_bytes)
    except Exception:
        vmem_cap = 0
    if vmem_cap >= 100 * 1024 * 1024:          # v5e / v6e: 128 MiB physical VMEM
        return 64 * 1024 * 1024, 1024
    if vmem_cap > 0:                           # v7x: 64 MiB physical VMEM
        return 48 * 1024 * 1024, 512
    return 32 * 1024 * 1024, 512               # unknown: conservative defaults


# ---------------------------------------------------------------------------
# Forward (per-call: only the activation path is traced)
# ---------------------------------------------------------------------------
def contrastive_forward(phn, prepared, *, tb=None, out_dtype=jnp.float32):
    """phn: [B, in_dim] float array.  prepared: output of prepare_params().

    tb: rows per grid step (defaults per generation: 1024 on 128 MiB chips,
        512 on v7x).  out_dtype=jnp.bfloat16 also halves the output writeback
        if downstream tolerates it.
    """
    weights, dims = prepared
    B, in_dim = phn.shape
    assert in_dim == dims["in_dim"], (in_dim, dims["in_dim"])
    in_p, h1_p, ft_p, h2_p, pr_p = (dims[k] for k in
                                    ("in_p", "h1_p", "ft_p", "h2_p", "pr_p"))
    proj = dims["proj"]

    vmem_limit, tb_default = _device_budget()
    if tb is None:
        tb = tb_default
    tb = min(tb, _round_up(B, SUBLANE))        # don't over-tile tiny batches
    if B > 512:
        # Keep >= 2 grid steps for large batches so the "parallel" batch axis can be
        # sharded across v7x's two TensorCores (harmless on single-TC v5e/v6e).
        tb = min(tb, _round_up(pl.cdiv(B, 2), SUBLANE))
    tb = max(SUBLANE, _round_up(tb, SUBLANE))
    nb = pl.cdiv(B, tb)

    # Only per-call data prep: bf16 cast (numerically free, the first matmul is bf16
    # anyway) + lane-pad of the feature dim only.  No batch-dim padding copy; the
    # partial last block (if any) is handled by Pallas and its rows are discarded.
    x_p = phn.astype(jnp.bfloat16)
    if in_p != in_dim:
        x_p = jnp.pad(x_p, ((0, 0), (0, in_p - in_dim)))

    def _const_spec(a, single_buffer):
        # Weights/biases: constant index_map -> fetched once, VMEM-resident across
        # all batch tiles.  Single-buffered when supported (block never changes).
        if single_buffer:
            return pl.BlockSpec(a.shape, lambda i: (0, 0),
                                pipeline_mode=pl.Buffered(buffer_count=1))
        return pl.BlockSpec(a.shape, lambda i: (0, 0))

    flops = 2 * nb * tb * (in_p * h1_p + h1_p * ft_p + ft_p * h2_p + h2_p * pr_p)
    bytes_accessed = (int(x_p.size) * x_p.dtype.itemsize
                      + sum(int(a.size) * a.dtype.itemsize for a in weights)
                      + B * pr_p * jnp.dtype(out_dtype).itemsize)

    def _call(single_buffer_weights):
        return pl.pallas_call(
            contrastive_kernel,
            out_shape=jax.ShapeDtypeStruct((B, pr_p), out_dtype),
            grid=(nb,),
            in_specs=[pl.BlockSpec((tb, in_p), lambda i: (i, 0))]
                     + [_const_spec(a, single_buffer_weights) for a in weights],
            out_specs=pl.BlockSpec((tb, pr_p), lambda i: (i, 0)),
            compiler_params=pltpu.CompilerParams(
                # NOTE: plain "parallel" kept for portability; on v7x verify in a
                # trace that batch tiles are actually sharded across both
                # TensorCores (switch to pltpu.CORE_PARALLEL / pl.core_map if not).
                dimension_semantics=("parallel",),
                vmem_limit_bytes=vmem_limit,
            ),
            cost_estimate=pl.CostEstimate(
                flops=flops, transcendentals=0, bytes_accessed=bytes_accessed),
        )(x_p, *weights)

    try:
        out_p = _call(single_buffer_weights=True)
    except Exception:
        # Fallback for JAX versions without BlockSpec.pipeline_mode / Buffered(1):
        # default (double-buffered) weight residency, identical results.
        out_p = _call(single_buffer_weights=False)

    return out_p[:, :proj]


# ---------------------------------------------------------------------------
# Parameters + reference
# ---------------------------------------------------------------------------
def init_params(key, in_dim, hidden_dim, feat_dim, proj_dim):
    """Deterministic synthetic parameters (Kaiming-ish scaling), stored as [in, out]."""
    ks = jax.random.split(key, 8)

    def lin(kw, kb, fan_in, fan_out):
        bound = 1.0 / jnp.sqrt(fan_in)
        w = jax.random.uniform(kw, (fan_in, fan_out), jnp.float32, -bound, bound)
        b = jax.random.uniform(kb, (1, fan_out), jnp.float32, -bound, bound)
        return w, b

    w1, b1 = lin(ks[0], ks[1], in_dim, hidden_dim)      # feature layer 1
    w2, b2 = lin(ks[2], ks[3], hidden_dim, feat_dim)    # feature layer 2
    w3, b3 = lin(ks[4], ks[5], feat_dim, hidden_dim)    # projection layer 1
    w4, b4 = lin(ks[6], ks[7], hidden_dim, proj_dim)    # projection layer 2
    return dict(w1=w1, b1=b1, w2=w2, b2=b2, w3=w3, b3=b3, w4=w4, b4=b4)


def reference_forward(phn, p):
    h = jnp.maximum(phn @ p["w1"] + p["b1"], 0.0)
    feat = h @ p["w2"] + p["b2"]
    q = jnp.maximum(feat @ p["w3"] + p["b3"], 0.0)
    return q @ p["w4"] + p["b4"]


if __name__ == "__main__":
    # Small demo shapes; tb=128 forces multiple batch tiles so the pipelined grid
    # (and the constant, VMEM-resident weight path) is exercised.
    B, IN_DIM, HIDDEN, FEAT, PROJ = 256, 64, 32, 32, 16
    TB = 128

    key = jax.random.PRNGKey(0)
    k_x, k_p = jax.random.split(key)

    phn = jax.random.normal(k_x, (B, IN_DIM), dtype=jnp.float32)
    params = init_params(k_p, IN_DIM, HIDDEN, FEAT, PROJ)

    prepared = prepare_params(params)            # one-time pad + bf16 cast
    out = contrastive_forward(phn, prepared, tb=TB)
    out = jax.block_until_ready(out)

    # Sanity check against a plain-JAX f32 reference. bf16 MXU operands => looser tol.
    ref = jax.block_until_ready(reference_forward(phn, params))
    assert out.shape == (B, PROJ), out.shape
    assert jnp.allclose(out, ref, atol=3e-2, rtol=3e-2), (
        float(jnp.max(jnp.abs(out - ref))))

    print("KERNEL_OK")
</pallas_src>

<mosaic_0001>
module attributes {stable_mosaic.version = 11 : i64} {
  func.func @contrastive_kernel(%arg0: i32, %arg1: memref<128x128xbf16, #tpu.memory_space<vmem>>, %arg2: memref<128x128xbf16, #tpu.memory_space<vmem>>, %arg3: memref<1x128xf32, #tpu.memory_space<vmem>>, %arg4: memref<128x128xbf16, #tpu.memory_space<vmem>>, %arg5: memref<1x128xf32, #tpu.memory_space<vmem>>, %arg6: memref<128x128xbf16, #tpu.memory_space<vmem>>, %arg7: memref<1x128xf32, #tpu.memory_space<vmem>>, %arg8: memref<128x128xbf16, #tpu.memory_space<vmem>>, %arg9: memref<1x128xf32, #tpu.memory_space<vmem>>, %arg10: memref<128x128xf32, #tpu.memory_space<vmem>>) attributes {dimension_semantics = [#tpu.dimension_semantics<parallel>], iteration_bounds = array<i64: 2>, scalar_prefetch = 0 : i64, scratch_operands = 0 : i64, tpu.core_type = #tpu.core_type<tc>, window_params = [{transform_indices = @transform_0, window_bounds = array<i64: 128, 128>}, {pipeline_mode = #tpu.pipeline_mode<synchronous>, transform_indices = @transform_1, window_bounds = array<i64: 128, 128>}, {pipeline_mode = #tpu.pipeline_mode<synchronous>, transform_indices = @transform_2, window_bounds = array<i64: 1, 128>}, {pipeline_mode = #tpu.pipeline_mode<synchronous>, transform_indices = @transform_3, window_bounds = array<i64: 128, 128>}, {pipeline_mode = #tpu.pipeline_mode<synchronous>, transform_indices = @transform_4, window_bounds = array<i64: 1, 128>}, {pipeline_mode = #tpu.pipeline_mode<synchronous>, transform_indices = @transform_5, window_bounds = array<i64: 128, 128>}, {pipeline_mode = #tpu.pipeline_mode<synchronous>, transform_indices = @transform_6, window_bounds = array<i64: 1, 128>}, {pipeline_mode = #tpu.pipeline_mode<synchronous>, transform_indices = @transform_7, window_bounds = array<i64: 128, 128>}, {pipeline_mode = #tpu.pipeline_mode<synchronous>, transform_indices = @transform_8, window_bounds = array<i64: 1, 128>}, {transform_indices = @transform_9, window_bounds = array<i64: 128, 128>}]} {
    %c0 = arith.constant 0 : index
    %c0_0 = arith.constant 0 : index
    %0 = vector.load %arg1[%c0, %c0_0] : memref<128x128xbf16, #tpu.memory_space<vmem>>, vector<128x128xbf16>
    %c0_1 = arith.constant 0 : index
    %c0_2 = arith.constant 0 : index
    %1 = vector.load %arg2[%c0_1, %c0_2] : memref<128x128xbf16, #tpu.memory_space<vmem>>, vector<128x128xbf16>
    %cst = arith.constant dense<0.000000e+00> : vector<128x128xf32>
    %2 = tpu.matmul %0, %1, %cst {dimension_numbers = #tpu.dot_dimension_numbers<[1], [0], [0], [1], [0, 0, 1, 1], [], []>} : vector<128x128xbf16>, vector<128x128xbf16>, vector<128x128xf32> -> vector<128x128xf32>
    %c0_3 = arith.constant 0 : index
    %c0_4 = arith.constant 0 : index
    %3 = vector.load %arg3[%c0_3, %c0_4] : memref<1x128xf32, #tpu.memory_space<vmem>>, vector<1x128xf32>
    %4 = vector.broadcast %3 : vector<1x128xf32> to vector<128x128xf32>
    %5 = arith.addf %2, %4 : vector<128x128xf32>
    %cst_5 = arith.constant 0.000000e+00 : f32
    %6 = vector.broadcast %cst_5 : f32 to vector<128x128xf32>
    %7 = arith.maximumf %5, %6 : vector<128x128xf32>
    %8 = arith.truncf %7 : vector<128x128xf32> to vector<128x128xbf16>
    %c0_6 = arith.constant 0 : index
    %c0_7 = arith.constant 0 : index
    %9 = vector.load %arg4[%c0_6, %c0_7] : memref<128x128xbf16, #tpu.memory_space<vmem>>, vector<128x128xbf16>
    %cst_8 = arith.constant dense<0.000000e+00> : vector<128x128xf32>
    %10 = tpu.matmul %8, %9, %cst_8 {dimension_numbers = #tpu.dot_dimension_numbers<[1], [0], [0], [1], [0, 0, 1, 1], [], []>} : vector<128x128xbf16>, vector<128x128xbf16>, vector<128x128xf32> -> vector<128x128xf32>
    %c0_9 = arith.constant 0 : index
    %c0_10 = arith.constant 0 : index
    %11 = vector.load %arg5[%c0_9, %c0_10] : memref<1x128xf32, #tpu.memory_space<vmem>>, vector<1x128xf32>
    %12 = vector.broadcast %11 : vector<1x128xf32> to vector<128x128xf32>
    %13 = arith.addf %10, %12 : vector<128x128xf32>
    %14 = arith.truncf %13 : vector<128x128xf32> to vector<128x128xbf16>
    %c0_11 = arith.constant 0 : index
    %c0_12 = arith.constant 0 : index
    %15 = vector.load %arg6[%c0_11, %c0_12] : memref<128x128xbf16, #tpu.memory_space<vmem>>, vector<128x128xbf16>
    %cst_13 = arith.constant dense<0.000000e+00> : vector<128x128xf32>
    %16 = tpu.matmul %14, %15, %cst_13 {dimension_numbers = #tpu.dot_dimension_numbers<[1], [0], [0], [1], [0, 0, 1, 1], [], []>} : vector<128x128xbf16>, vector<128x128xbf16>, vector<128x128xf32> -> vector<128x128xf32>
    %c0_14 = arith.constant 0 : index
    %c0_15 = arith.constant 0 : index
    %17 = vector.load %arg7[%c0_14, %c0_15] : memref<1x128xf32, #tpu.memory_space<vmem>>, vector<1x128xf32>
    %18 = vector.broadcast %17 : vector<1x128xf32> to vector<128x128xf32>
    %19 = arith.addf %16, %18 : vector<128x128xf32>
    %cst_16 = arith.constant 0.000000e+00 : f32
    %20 = vector.broadcast %cst_16 : f32 to vector<128x128xf32>
    %21 = arith.maximumf %19, %20 : vector<128x128xf32>
    %22 = arith.truncf %21 : vector<128x128xf32> to vector<128x128xbf16>
    %c0_17 = arith.constant 0 : index
    %c0_18 = arith.constant 0 : index
    %23 = vector.load %arg8[%c0_17, %c0_18] : memref<128x128xbf16, #tpu.memory_space<vmem>>, vector<128x128xbf16>
    %cst_19 = arith.constant dense<0.000000e+00> : vector<128x128xf32>
    %24 = tpu.matmul %22, %23, %cst_19 {dimension_numbers = #tpu.dot_dimension_numbers<[1], [0], [0], [1], [0, 0, 1, 1], [], []>} : vector<128x128xbf16>, vector<128x128xbf16>, vector<128x128xf32> -> vector<128x128xf32>
    %c0_20 = arith.constant 0 : index
    %c0_21 = arith.constant 0 : index
    %25 = vector.load %arg9[%c0_20, %c0_21] : memref<1x128xf32, #tpu.memory_space<vmem>>, vector<1x128xf32>
    %26 = vector.broadcast %25 : vector<1x128xf32> to vector<128x128xf32>
    %27 = arith.addf %24, %26 : vector<128x128xf32>
    %c0_22 = arith.constant 0 : index
    %c0_23 = arith.constant 0 : index
    %28 = vector.load %arg10[%c0_22, %c0_23] : memref<128x128xf32, #tpu.memory_space<vmem>>, vector<128x128xf32>
    tpu.vector_store %arg10[%c0_22, %c0_23], %27 {strides = array<i32>} : memref<128x128xf32, #tpu.memory_space<vmem>>, vector<128x128xf32>,
    return
  }
  func.func @transform_0(%arg0: i32) -> (i32, i32) {
    %c0_i32 = arith.constant 0 : i32
    %c0_i32_0 = arith.constant 0 : i32
    return %arg0, %c0_i32 : i32, i32
  }
  func.func @transform_1(%arg0: i32) -> (i32, i32) {
    %c0_i32 = arith.constant 0 : i32
    %c0_i32_0 = arith.constant 0 : i32
    %c0_i32_1 = arith.constant 0 : i32
    return %c0_i32, %c0_i32_0 : i32, i32
  }
  func.func @transform_2(%arg0: i32) -> (i32, i32) {
    %c0_i32 = arith.constant 0 : i32
    %c0_i32_0 = arith.constant 0 : i32
    %c0_i32_1 = arith.constant 0 : i32
    return %c0_i32, %c0_i32_0 : i32, i32
  }
  func.func @transform_3(%arg0: i32) -> (i32, i32) {
    %c0_i32 = arith.constant 0 : i32
    %c0_i32_0 = arith.constant 0 : i32
    %c0_i32_1 = arith.constant 0 : i32
    return %c0_i32, %c0_i32_0 : i32, i32
  }
  func.func @transform_4(%arg0: i32) -> (i32, i32) {
    %c0_i32 = arith.constant 0 : i32
    %c0_i32_0 = arith.constant 0 : i32
    %c0_i32_1 = arith.constant 0 : i32
    return %c0_i32, %c0_i32_0 : i32, i32
  }
  func.func @transform_5(%arg0: i32) -> (i32, i32) {
    %c0_i32 = arith.constant 0 : i32
    %c0_i32_0 = arith.constant 0 : i32
    %c0_i32_1 = arith.constant 0 : i32
    return %c0_i32, %c0_i32_0 : i32, i32
  }
  func.func @transform_6(%arg0: i32) -> (i32, i32) {
    %c0_i32 = arith.constant 0 : i32
    %c0_i32_0 = arith.constant 0 : i32
    %c0_i32_1 = arith.constant 0 : i32
    return %c0_i32, %c0_i32_0 : i32, i32
  }
  func.func @transform_7(%arg0: i32) -> (i32, i32) {
    %c0_i32 = arith.constant 0 : i32
    %c0_i32_0 = arith.constant 0 : i32
    %c0_i32_1 = arith.constant 0 : i32
    return %c0_i32, %c0_i32_0 : i32, i32
  }
  func.func @transform_8(%arg0: i32) -> (i32, i32) {
    %c0_i32 = arith.constant 0 : i32
    %c0_i32_0 = arith.constant 0 : i32
    %c0_i32_1 = arith.constant 0 : i32
    return %c0_i32, %c0_i32_0 : i32, i32
  }
  func.func @transform_9(%arg0: i32) -> (i32, i32) {
    %c0_i32 = arith.constant 0 : i32
    %c0_i32_0 = arith.constant 0 : i32
    return %arg0, %c0_i32 : i32, i32
  }
}

module attributes {stable_mosaic.version = 11 : i64} {
  func.func @contrastive_kernel(%arg0: i32, %arg1: memref<128x128xbf16, #tpu.memory_space<vmem>>, %arg2: memref<128x128xbf16, #tpu.memory_space<vmem>>, %arg3: memref<1x128xf32, #tpu.memory_space<vmem>>, %arg4: memref<128x128xbf16, #tpu.memory_space<vmem>>, %arg5: memref<1x128xf32, #tpu.memory_space<vmem>>, %arg6: memref<128x128xbf16, #tpu.memory_space<vmem>>, %arg7: memref<1x128xf32, #tpu.memory_space<vmem>>, %arg8: memref<128x128xbf16, #tpu.memory_space<vmem>>, %arg9: memref<1x128xf32, #tpu.memory_space<vmem>>, %arg10: memref<128x128xf32, #tpu.memory_space<vmem>>) attributes {dimension_semantics = [#tpu.dimension_semantics<parallel>], iteration_bounds = array<i64: 2>, scalar_prefetch = 0 : i64, scratch_operands = 0 : i64, tpu.core_type = #tpu.core_type<tc>, window_params = [{transform_indices = @transform_0, window_bounds = array<i64: 128, 128>}, {pipeline_mode = #tpu.pipeline_mode<synchronous>, transform_indices = @transform_1, window_bounds = array<i64: 128, 128>}, {pipeline_mode = #tpu.pipeline_mode<synchronous>, transform_indices = @transform_2, window_bounds = array<i64: 1, 128>}, {pipeline_mode = #tpu.pipeline_mode<synchronous>, transform_indices = @transform_3, window_bounds = array<i64: 128, 128>}, {pipeline_mode = #tpu.pipeline_mode<synchronous>, transform_indices = @transform_4, window_bounds = array<i64: 1, 128>}, {pipeline_mode = #tpu.pipeline_mode<synchronous>, transform_indices = @transform_5, window_bounds = array<i64: 128, 128>}, {pipeline_mode = #tpu.pipeline_mode<synchronous>, transform_indices = @transform_6, window_bounds = array<i64: 1, 128>}, {pipeline_mode = #tpu.pipeline_mode<synchronous>, transform_indices = @transform_7, window_bounds = array<i64: 128, 128>}, {pipeline_mode = #tpu.pipeline_mode<synchronous>, transform_indices = @transform_8, window_bounds = array<i64: 1, 128>}, {transform_indices = @transform_9, window_bounds = array<i64: 128, 128>}]} {
    %c0 = arith.constant 0 : index
    %c0_0 = arith.constant 0 : index
    %0 = vector.load %arg1[%c0, %c0_0] : memref<128x128xbf16, #tpu.memory_space<vmem>>, vector<128x128xbf16>
    %c0_1 = arith.constant 0 : index
    %c0_2 = arith.constant 0 : index
    %1 = vector.load %arg2[%c0_1, %c0_2] : memref<128x128xbf16, #tpu.memory_space<vmem>>, vector<128x128xbf16>
    %cst = arith.constant dense<0.000000e+00> : vector<128x128xf32>
    %2 = tpu.matmul %0, %1, %cst {dimension_numbers = #tpu.dot_dimension_numbers<[1], [0], [0], [1], [0, 0, 1, 1], [], []>} : vector<128x128xbf16>, vector<128x128xbf16>, vector<128x128xf32> -> vector<128x128xf32>
    %c0_3 = arith.constant 0 : index
    %c0_4 = arith.constant 0 : index
    %3 = vector.load %arg3[%c0_3, %c0_4] : memref<1x128xf32, #tpu.memory_space<vmem>>, vector<1x128xf32>
    %4 = vector.broadcast %3 : vector<1x128xf32> to vector<128x128xf32>
    %5 = arith.addf %2, %4 : vector<128x128xf32>
    %cst_5 = arith.constant 0.000000e+00 : f32
    %6 = vector.broadcast %cst_5 : f32 to vector<128x128xf32>
    %7 = arith.maximumf %5, %6 : vector<128x128xf32>
    %8 = arith.truncf %7 : vector<128x128xf32> to vector<128x128xbf16>
    %c0_6 = arith.constant 0 : index
    %c0_7 = arith.constant 0 : index
    %9 = vector.load %arg4[%c0_6, %c0_7] : memref<128x128xbf16, #tpu.memory_space<vmem>>, vector<128x128xbf16>
    %cst_8 = arith.constant dense<0.000000e+00> : vector<128x128xf32>
    %10 = tpu.matmul %8, %9, %cst_8 {dimension_numbers = #tpu.dot_dimension_numbers<[1], [0], [0], [1], [0, 0, 1, 1], [], []>} : vector<128x128xbf16>, vector<128x128xbf16>, vector<128x128xf32> -> vector<128x128xf32>
    %c0_9 = arith.constant 0 : index
    %c0_10 = arith.constant 0 : index
    %11 = vector.load %arg5[%c0_9, %c0_10] : memref<1x128xf32, #tpu.memory_space<vmem>>, vector<1x128xf32>
    %12 = vector.broadcast %11 : vector<1x128xf32> to vector<128x128xf32>
    %13 = arith.addf %10, %12 : vector<128x128xf32>
    %14 = arith.truncf %13 : vector<128x128xf32> to vector<128x128xbf16>
    %c0_11 = arith.constant 0 : index
    %c0_12 = arith.constant 0 : index
    %15 = vector.load %arg6[%c0_11, %c0_12] : memref<128x128xbf16, #tpu.memory_space<vmem>>, vector<128x128xbf16>
    %cst_13 = arith.constant dense<0.000000e+00> : vector<128x128xf32>
    %16 = tpu.matmul %14, %15, %cst_13 {dimension_numbers = #tpu.dot_dimension_numbers<[1], [0], [0], [1], [0, 0, 1, 1], [], []>} : vector<128x128xbf16>, vector<128x128xbf16>, vector<128x128xf32> -> vector<128x128xf32>
    %c0_14 = arith.constant 0 : index
    %c0_15 = arith.constant 0 : index
    %17 = vector.load %arg7[%c0_14, %c0_15] : memref<1x128xf32, #tpu.memory_space<vmem>>, vector<1x128xf32>
    %18 = vector.broadcast %17 : vector<1x128xf32> to vector<128x128xf32>
    %19 = arith.addf %16, %18 : vector<128x128xf32>
    %cst_16 = arith.constant 0.000000e+00 : f32
    %20 = vector.broadcast %cst_16 : f32 to vector<128x128xf32>
    %21 = arith.maximumf %19, %20 : vector<128x128xf32>
    %22 = arith.truncf %21 : vector<128x128xf32> to vector<128x128xbf16>
    %c0_17 = arith.constant 0 : index
    %c0_18 = arith.constant 0 : index
    %23 = vector.load %arg8[%c0_17, %c0_18] : memref<128x128xbf16, #tpu.memory_space<vmem>>, vector<128x128xbf16>
    %cst_19 = arith.constant dense<0.000000e+00> : vector<128x128xf32>
    %24 = tpu.matmul %22, %23, %cst_19 {dimension_numbers = #tpu.dot_dimension_numbers<[1], [0], [0], [1], [0, 0, 1, 1], [], []>} : vector<128x128xbf16>, vector<128x128xbf16>, vector<128x128xf32> -> vector<128x128xf32>
    %c0_20 = arith.constant 0 : index
    %c0_21 = arith.constant 0 : index
    %25 = vector.load %arg9[%c0_20, %c0_21] : memref<1x128xf32, #tpu.memory_space<vmem>>, vector<1x128xf32>
    %26 = vector.broadcast %25 : vector<1x128xf32> to vector<128x128xf32>
    %27 = arith.addf %24, %26 : vector<128x128xf32>
    %c0_22 = arith.constant 0 : index
    %c0_23 = arith.constant 0 : index
    %28 = vector.load %arg10[%c0_22, %c0_23] : memref<128x128xf32, #tpu.memory_space<vmem>>, vector<128x128xf32>
    tpu.vector_store %arg10[%c0_22, %c0_23], %27 {strides = array<i32>} : memref<128x128xf32, #tpu.memory_space<vmem>>, vector<128x128xf32>,
    return
  }
  func.func @transform_0(%arg0: i32) -> (i32, i32) {
    %c0_i32 = arith.constant 0 : i32
    %c0_i32_0 = arith.constant 0 : i32
    return %arg0, %c0_i32 : i32, i32
  }
  func.func @transform_1(%arg0: i32) -> (i32, i32) {
    %c0_i32 = arith.constant 0 : i32
    %c0_i32_0 = arith.constant 0 : i32
    %c0_i32_1 = arith.constant 0 : i32
    return %c0_i32, %c0_i32_0 : i32, i32
  }
  func.func @transform_2(%arg0: i32) -> (i32, i32) {
    %c0_i32 = arith.constant 0 : i32
    %c0_i32_0 = arith.constant 0 : i32
    %c0_i32_1 = arith.constant 0 : i32
    return %c0_i32, %c0_i32_0 : i32, i32
  }
  func.func @transform_3(%arg0: i32) -> (i32, i32) {
    %c0_i32 = arith.constant 0 : i32
    %c0_i32_0 = arith.constant 0 : i32
    %c0_i32_1 = arith.constant 0 : i32
    return %c0_i32, %c0_i32_0 : i32, i32
  }
  func.func @transform_4(%arg0: i32) -> (i32, i32) {
    %c0_i32 = arith.constant 0 : i32
    %c0_i32_0 = arith.constant 0 : i32
    %c0_i32_1 = arith.constant 0 : i32
    return %c0_i32, %c0_i32_0 : i32, i32
  }
  func.func @transform_5(%arg0: i32) -> (i32, i32) {
    %c0_i32 = arith.constant 0 : i32
    %c0_i32_0 = arith.constant 0 : i32
    %c0_i32_1 = arith.constant 0 : i32
    return %c0_i32, %c0_i32_0 : i32, i32
  }
  func.func @transform_6(%arg0: i32) -> (i32, i32) {
    %c0_i32 = arith.constant 0 : i32
    %c0_i32_0 = arith.constant 0 : i32
    %c0_i32_1 = arith.constant 0 : i32
    return %c0_i32, %c0_i32_0 : i32, i32
  }
  func.func @transform_7(%arg0: i32) -> (i32, i32) {
    %c0_i32 = arith.constant 0 : i32
    %c0_i32_0 = arith.constant 0 : i32
    %c0_i32_1 = arith.constant 0 : i32
    return %c0_i32, %c0_i32_0 : i32, i32
  }
  func.func @transform_8(%arg0: i32) -> (i32, i32) {
    %c0_i32 = arith.constant 0 : i32
    %c0_i32_0 = arith.constant 0 : i32
    %c0_i32_1 = arith.constant 0 : i32
    return %c0_i32, %c0_i32_0 : i32, i32
  }
  func.func @transform_9(%arg0: i32) -> (i32, i32) {
    %c0_i32 = arith.constant 0 : i32
    %c0_i32_0 = arith.constant 0 : i32
    return %arg0, %c0_i32 : i32, i32
  }
}

</mosaic_0001>

<bundles_post_ra>
// kernel: tpu_custom_call.1
= control target key start
LH: loop header
LB: loop body
LE: loop exit
PB: predicated region body
PF: predicated region fallthrough
CT: control target
= control target key end

     0   :  { %s2267_s0 = inlined_call_operand.hbm [shape: bf16[256,128], index: 0, kind: input, shape index: {}]   ;;  %s2268_s1 = inlined_call_operand.hbm [shape: bf16[128,128], index: 1, kind: input, shape index: {}]   ;;  %s2269_s2 = inlined_call_operand.vmem [shape: f32[1,128], index: 2, kind: input, shape index: {}]   ;;  %s2270_s3 = inlined_call_operand.hbm [shape: bf16[128,128], index: 3, kind: input, shape index: {}]   ;;  %s2271_s4 = inlined_call_operand.vmem [shape: f32[1,128], index: 4, kind: input, shape index: {}]   ;;  %s2272_s5 = inlined_call_operand.hbm [shape: bf16[128,128], index: 5, kind: input, shape index: {}]   ;;  %s2273_s6 = inlined_call_operand.vmem [shape: f32[1,128], index: 6, kind: input, shape index: {}]   ;;  %s2274_s7 = inlined_call_operand.hbm [shape: bf16[128,128], index: 7, kind: input, shape index: {}]   ;;  %s2275_s8 = inlined_call_operand.vmem [shape: f32[1,128], index: 8, kind: input, shape index: {}]   ;;  %s2276_s9 = inlined_call_operand.hbm [shape: f32[256,128], index: 9, kind: output, shape index: {}]  }
   0x1   :  { %2283 = sst [smem:[#allocation16_spill]] %s2268_s1 }
   0x2   :  { %2284 = sst [smem:[#allocation17_spill]] %s2270_s3 }
   0x3   :  { %2285 = sst [smem:[#allocation18_spill]] %s2272_s5 }
   0x4   :  { %14 = vsyncpa [#allocation3], 0 }
   0x5   :  { %16 = vsyncpa [#allocation3 + $0x1], 0 }
   0x6   :  { %17 = vsyncpa [#allocation6], 0 }
   0x7   :  { %18 = vsyncpa [#allocation9], 0 }
   0x8   :  { %19 = vsyncpa [#allocation4], 0 }
   0x9   :  { %21 = vsyncpa [#allocation4 + $0x1], 0  ;;  %s2002_s30 = smov 0   ;;  %s2004_s10 = smov 0  }
   0xa   :  { %s2006_s11 = smov 0   ;;  %s2008_s12 = smov 0  }
   0xb LB: > { %s2023_s13 = sadd.s32 4294967295, %s1940_s12   ;;  %s1345_s14 = sadd.s32 4294967294, %s1940_s12   ;;  %s1940_s12 = sphi %s2008_s12, %s2309_s12   ;;  %s1936_s11 = sphi %s2006_s11, %s2308_s11   ;;  %s1932_s10 = sphi %s2004_s10, %s2307_s10   ;;  %s1928_s30 = sphi %s2002_s30, %s2306_s30  }
   0xc   : > { %p47_p0 = scmp.ne.s32.totalorder %s1932_s10, %s1928_s30  ;;  %p2277_p1 = scmp.eq.s32.totalorder %s2023_s13, 0 }
   0xd   : > { %p239_p2 = scmp.eq.s32.totalorder %s2023_s13, 1  ;;  %p245_p3 = scmp.eq.s32.totalorder %s1345_s14, 1 }
   0xe   : > { %p2032_p4 = por %p2277_p1, %p47_p0  ;;  %p1346_p5 = scmp.ge.s32.totalorder %s1940_s12, 1 }
   0xf   : > { %p2037_p6 = por %p245_p3, %p47_p0  ;;  %p252_p7 = scmp.lt.s32.totalorder %s1940_s12, 3 }
  0x10   : > { %s2286_s15 = scalar_select %p2032_p4, 1, 0 }
  0x11   : > { %s2287_s16 = scalar_select %p2037_p6, 1, 0 }
  0x12   : > { %p2042_p8 = pnand %p1346_p5, %p252_p7  ;;  %s1942_s18 = smov [#allocation5]  }
  0x13   : > { %s264_s19 = sshll.u32 %s1942_s18, 4  ;;  %s1943_s21 = smov [#allocation8]   ;;  %s265_s19 = int_to_ptr.vmem [resolvable:$true] %s264_s19 }
  0x14   : > { %s2288_s17 = scalar_select %p2042_p8, 1, 0 }
  0x15   : > { %p1625_p9 = pneg %p2042_p8  ;;  %s296_s22 = sshll.u32 %s1943_s21, 4  ;;  %s297_s22 = int_to_ptr.vmem [resolvable:$true] %s296_s22 }
  0x16   : > { %s1944_s23 = smov [#allocation7]   ;;  %s1747_s25 = scalar_lea.vmem %s265_s19, 1024 }
  0x17   : > { %p2051_p11 = pnand %p1625_p9, %p2277_p1  ;;  %s280_s24 = sshll.u32 %s1944_s23, 4  ;;  %s281_s24 = int_to_ptr.vmem [resolvable:$true] %s280_s24 }
  0x18   : > { %p1748_p13 = scmp.ne.s32.totalorder %s265_s19, %s1747_s25  ;;  %p1755_p5 = scmp.lt.s32.totalorder %s265_s19, %s265_s19 }
  0x19   : > { %p1738_p12 = pneg %p2051_p11  ;;  %p1756_p7 = scmp.lt.s32.totalorder %s1747_s25, %s1747_s25 }
  0x1b   : > { %p1750_p0 = pnand %p1748_p13, %p1738_p12  ;;  %p1757_p9 = por %p1756_p7, %p1755_p5 }
  0x1d   : > { %p1751_p3 = pneg %p1750_p0 }
  0x1f   : > { %p1758_p10 = pnand %p1757_p9, %p1751_p3 }
  0x21   : > { %1761 = shalt.err (!%p1758_p10)
}
  0x22   : > { %s2278_s26 = smov 64   ;;  %s2279_s27 = smov 4  }
  0x23   : > { %s2290_s1 = sld [smem:[#allocation16_spill]]  ;;  %s1773_s14 = scalar_lea.vmem %s297_s22, 1024 }
  0x24   : > { %p1774_p13 = scmp.ne.s32.totalorder %s297_s22, %s1773_s14  ;;  %p1781_p3 = scmp.lt.s32.totalorder %s297_s22, %s297_s22 }
  0x25   : > { %p1782_p10 = scmp.lt.s32.totalorder %s1773_s14, %s1773_s14 }
  0x26   : > { %p1776_p0 = pnand %p1774_p13, %p1738_p12 }
  0x27   : > { %p1783_p7 = por %p1782_p10, %p1781_p3 }
  0x28   : > { %p1777_p5 = pneg %p1776_p0 }
  0x29   : > { %1628 = dma.hbm_to_vmem [thread:$0]  (!%p2051_p11), %s2290_s1, 1024, %s265_s19, [#allocation6], %s2278_s26, %s2278_s26, %s2279_s27  }
  0x2a   : > { %p1784_p9 = pnand %p1783_p7, %p1777_p5 }
  0x2c   : > { %1787 = shalt.err (!%p1784_p9)
}
  0x2d   : > { %s2291_s5 = sld [smem:[#allocation18_spill]]  ;;  %s1799_s19 = scalar_lea.vmem %s281_s24, 1024 }
  0x2e   : > { %p1800_p1 = scmp.ne.s32.totalorder %s281_s24, %s1799_s19  ;;  %p1807_p3 = scmp.lt.s32.totalorder %s281_s24, %s281_s24 }
  0x2f   : > { %p1808_p5 = scmp.lt.s32.totalorder %s1799_s19, %s1799_s19 }
  0x30   : > { %p1802_p13 = pnand %p1800_p1, %p1738_p12 }
  0x31   : > { %p1809_p10 = por %p1808_p5, %p1807_p3 }
  0x32   : > { %p1803_p0 = pneg %p1802_p13 }
  0x33   : > { %1634 = dma.hbm_to_vmem [thread:$0]  (!%p2051_p11), %s2291_s5, 1024, %s297_s22, [#allocation9], %s2278_s26, %s2278_s26, %s2279_s27  }
  0x34   : > { %p1810_p7 = pnand %p1809_p10, %p1803_p0 }
  0x36   : > { %1813 = shalt.err (!%p1810_p7)
}
  0x37   : > { %s2292_s3 = sld [smem:[#allocation17_spill]]  ;;  %s1947_s22 = smov [#allocation10]  }
  0x38   : > { %s312_s28 = sshll.u32 %s1947_s22, 4  ;;  %s313_s28 = int_to_ptr.vmem [resolvable:$true] %s312_s28 }
  0x39   : > { %s1825_s29 = scalar_lea.vmem %s313_s28, 1024  ;;  %p1833_p0 = scmp.lt.s32.totalorder %s313_s28, %s313_s28 }
  0x3a   : > { %p1826_p1 = scmp.ne.s32.totalorder %s313_s28, %s1825_s29  ;;  %p1834_p3 = scmp.lt.s32.totalorder %s1825_s29, %s1825_s29 }
  0x3c   : > { %p1828_p9 = pnand %p1826_p1, %p1738_p12  ;;  %p1835_p5 = por %p1834_p3, %p1833_p0 }
  0x3d   : > { %1631 = dma.hbm_to_vmem [thread:$0]  (!%p2051_p11), %s2292_s3, 1024, %s281_s24, [#allocation6], %s2278_s26, %s2278_s26, %s2279_s27  }
  0x3e   : > { %p1829_p13 = pneg %p1828_p9 }
  0x40   : > { %p1836_p10 = pnand %p1835_p5, %p1829_p13 }
  0x42   : > { %1839 = shalt.err (!%p1836_p10)
}
  0x43   : > { %1637 = dma.hbm_to_vmem [thread:$0]  (!%p2051_p11), %s2274_s7, 1024, %s313_s28, [#allocation9], %s2278_s26, %s2278_s26, %s2279_s27  }
  0x44   : > { %s2102_s18 = sadd.s32 1, %s1940_s12   ;;  %s34_s20 = sadd.s32 1, %s1936_s11 }
  0x45   : > { %s31_s21 = ssub.s32 %s1940_s12, %s2102_s18  ;;  %p41_p12 = scmp.ne.s32.totalorder %s1936_s11, %s1932_s10 }
  0x46   : > { %p32_p7 = scmp.eq.s32.totalorder %s31_s21, 0  ;;  %p42_p1 = scmp.eq.s32.totalorder %s1940_s12, 0 }
  0x47   : > { %p2112_p9 = por %p239_p2, %p41_p12  ;;  %p1650_p13 = scmp.lt.s32.totalorder %s1940_s12, 2 }
  0x48   : > { %s2118_s23 = scalar_select %p32_p7, %s1936_s11, %s34_s20  }
  0x49   : > { %s2293_s19 = scalar_select %p2112_p9, 1, 0 }
  0x4a   : > { %p43_p0 = por %p42_p1, %p41_p12  ;;  %s329_s25 = sand.u32 1, %s1936_s11  }
  0x4b   : > { %s1352_s22 = sshll.u32 %s329_s25, 6  ;;  %s1411_s28 = sshll.u32 %s1940_s12, 10 }
  0x4c   : > { %s2125_s14 = scalar_lea.hbm %s2267_s0, %s1411_s28  ;;  %s333_s21 = scalar_lea.vmem [#allocation2], %s1352_s22 }
  0x4d   : > { %s340_s26 = sshll.u32 %s333_s21, 4  ;;  %p2129_p2 = pnand %p1650_p13, %p43_p0  ;;  %s2127_s26 = int_to_ptr.vmem [resolvable:$true] %s340_s26 }
  0x4e   : > { %s2133_s20 = scalar_lea.sflag [#allocation3], %s329_s25  ;;  %s1840_s1 = scalar_lea.hbm %s2125_s14, 1024 }
  0x4f   : > { %p1841_p11 = scmp.ne.s32.totalorder %s2125_s14, %s1840_s1  ;;  %p1842_p3 = pneg %p2129_p2 }
  0x50   : > { %s1845_s22 = scalar_lea.hbm %s2267_s0, 2048  ;;  %p1846_p12 = scmp.lt.s32.totalorder %s2125_s14, %s2267_s0 }
  0x51   : > { %p1843_p5 = pnand %p1842_p3, %p1841_p11  ;;  %p1847_p7 = scmp.lt.s32.totalorder %s1845_s22, %s1840_s1 }
  0x53   : > { %p1844_p10 = pneg %p1843_p5  ;;  %p1848_p1 = por %p1847_p7, %p1846_p12 }
  0x55   : > { %p1849_p13 = pnand %p1848_p1, %p1844_p10 }
  0x57   : > { %1852 = shalt.err (!%p1849_p13)
}
  0x58   : > { %s1853_s25 = scalar_lea.vmem %s2127_s26, 1024  ;;  %s1948_s3 = smov [#allocation2]  }
  0x59   : > { %p1854_p0 = scmp.ne.s32.totalorder %s2127_s26, %s1853_s25  ;;  %s1858_s5 = sshll.u32 %s1948_s3, 4  ;;  %s1859_s5 = int_to_ptr.vmem [resolvable:$false] %s1858_s5 }
  0x5a   : > { %s1860_s28 = scalar_lea.vmem %s1859_s5, 2048  ;;  %p1861_p5 = scmp.lt.s32.totalorder %s2127_s26, %s1859_s5 }
  0x5b   : > { %p1856_p6 = pnand %p1854_p0, %p1842_p3  ;;  %p1862_p9 = scmp.lt.s32.totalorder %s1860_s28, %s1853_s25 }
  0x5d   : > { %p1857_p11 = pneg %p1856_p6  ;;  %p1863_p4 = por %p1862_p9, %p1861_p5 }
  0x5f   : > { %p1864_p8 = pnand %p1863_p4, %p1857_p11 }
  0x61   : > { %1867 = shalt.err (!%p1864_p8)
}
  0x62   : > { %s2295_s1 = smov 4   ;;  %s2296_s29 = smov 64  }
  0x63   : > { %1641 = dma.hbm_to_vmem [thread:$0]  (!%p2129_p2), %s2125_s14, 1024, %s2127_s26, %s2133_s20, %s2296_s29, %s2296_s29, %s2295_s1  }
  0x64   : > { %p2297_p6 = scmp.ne.s32.totalorder %s2288_s17, 0 }
  0x65   : > { %s2160_s3 = sand.u32 (!%p2297_p6), 1, %s1932_s10   ;;  %p2298_p4 = scmp.ne.s32.totalorder (!%p2297_p6), %s2286_s15, 0 }
  0x66   : > { %352 = sbr.rel (%p2297_p6) target bundleno = 1002 (0x3ea), region = 56  ;;  %s1356_s5 = sshll.u32 (!%p2297_p6), %s2160_s3, 6 }
  0x67   : > { %s355_s22 = scalar_lea.sflag (!%p2297_p6), [#allocation3], %s2160_s3  ;;  %s2164_s24 = scalar_lea.vmem (!%p2297_p6), [#allocation2], %s1356_s5 }
  0x6b   : > { %1911 = dma.done.wait (%p2298_p4), %s355_s22, 1024  }
  0x6c   : > { %1913 = vsyncadd (%p2298_p4), %s355_s22, 4294966272  ;;  %p2299_p8 = scmp.eq.s32.totalorder %s2023_s13, 0 }
  0x6e   : > { %1915 = dma.done.wait (%p2299_p8), [#allocation6], 2048   ;;  %p2300_p9 = pmov %p2299_p8 }
  0x6f   : > { %p2301_p2 = pmov %p2299_p8 }
  0x70   : > { %1917 = vsyncadd (%p2300_p9), [#allocation6], 4294965248 }
  0x71   : > { %1919 = dma.done.wait (%p2301_p2), [#allocation9], 2048   ;;  %p2302_p3 = pmov %p2301_p2 }
  0x72   : > { %v1696_v0 = vld [vmem:[#allocation5 + $0x38] sm:$0xff]   ;;  %v1697_v1 = vld [vmem:[#allocation5 + $0x30] sm:$0xff]   ;;  %v1698_v2 = vld [vmem:[#allocation5 + $0x28] sm:$0xff]   ;;  %s1361_s21 = sshll.u32 %s2160_s3, 7  ;;  %s1412_s29 = sshll.u32 %s2023_s13, 11 }
  0x73   : > { %1921 = vsyncadd (%p2302_p3), [#allocation9], 4294965248  ;;  %1477 = vmatprep.subr.bf16.mxu0 %v1696_v0  ;;  %v1699_v3 = vld [vmem:[#allocation5 + $0x20] sm:$0xff]   ;;  %v1700_v5 = vld [vmem:[#allocation5 + $0x18] sm:$0xff]   ;;  %s2199_s1 = scalar_lea.vmem [#allocation11], %s1361_s21  ;;  %s2220_s15 = scalar_lea.hbm %s2276_s9, %s1412_s29 }
  0x74   : > { %1478 = vmatpush3.bf16.msra.mxu0 %v1696_v0  ;;  %v1704_v4 = vld [vmem:[%s2164_s24] sm:$0xff]   ;;  %v1701_v6 = vld [vmem:[#allocation5 + $0x10] sm:$0xff]   ;;  %v1712_v7 = vld [vmem:[#allocation7 + $0x38] sm:$0xff]   ;;  %s1234_s5 = sshll.u32 %s2199_s1, 4  ;;  %s1221_s17 = scalar_lea.sflag [#allocation4], %s2160_s3  ;;  %s2222_s5 = int_to_ptr.vmem [resolvable:$true] %s1234_s5 }
  0x75   : > { %1479 = vmatprep.subr.bf16.mxu0 %v1697_v1  ;;  %1493 = vmatprep.mubr.bf16.mxu0 %v1704_v4  ;;  %v1713_v8 = vld [vmem:[#allocation7 + $0x30] sm:$0xff]   ;;  %v1702_v9 = vld [vmem:[#allocation5 + $0x8] sm:$0xff]   ;;  %v1703_v11 = vld [vmem:[#allocation5] sm:$0xff]   ;;  %s1868_s13 = scalar_lea.vmem %s2222_s5, 2048  ;;  %p2303_p12 = scmp.ne.s32.totalorder %s2293_s19, 0 }
  0x76   : > { %1509 = vmatprep.subr.bf16.mxu1 %v1712_v7  ;;  %v1714_v10 = vld [vmem:[#allocation7 + $0x28] sm:$0xff]   ;;  %v1715_v12 = vld [vmem:[#allocation7 + $0x20] sm:$0xff]   ;;  %v1716_v13 = vld [vmem:[#allocation7 + $0x18] sm:$0xff]   ;;  %p1869_p10 = scmp.ne.s32.totalorder %s2222_s5, %s1868_s13  ;;  %s1949_s26 = smov [#allocation11]  }
  0x77   : > { %1510 = vmatpush3.bf16.msra.mxu1 %v1712_v7  ;;  %v1705_v14 = vld [vmem:[%s2164_s24 + $0x8] sm:$0xff]   ;;  %v1706_v15 = vld [vmem:[%s2164_s24 + $0x10] sm:$0xff]   ;;  %v1707_v16 = vld [vmem:[%s2164_s24 + $0x18] sm:$0xff]   ;;  %s1872_s27 = sshll.u32 %s1949_s26, 4  ;;  %s1873_s27 = int_to_ptr.vmem [resolvable:$false] %s1872_s27 }
  0x78   : > { %1480 = vmatpush3.bf16.msra.mxu0 %v1697_v1  ;;  %1511 = vmatprep.subr.bf16.mxu1 %v1713_v8  ;;  %v1708_v17 = vld [vmem:[%s2164_s24 + $0x20] sm:$0xff]   ;;  %v1709_v18 = vld [vmem:[%s2164_s24 + $0x28] sm:$0xff]   ;;  %v1710_v19 = vld [vmem:[%s2164_s24 + $0x30] sm:$0xff]   ;;  %p1870_p7 = pnand %p1869_p10, %p2303_p12  ;;  %s1874_s14 = scalar_lea.vmem %s1873_s27, 4096 }
  0x79   : > { %1481 = vmatprep.subr.bf16.mxu0 %v1698_v2  ;;  %v1711_v20 = vld [vmem:[%s2164_s24 + $0x38] sm:$0xff]   ;;  %v1717_v21 = vld [vmem:[#allocation7 + $0x10] sm:$0xff]   ;;  %v1718_v22 = vld [vmem:[#allocation7 + $0x8] sm:$0xff]   ;;  %p1875_p13 = scmp.lt.s32.totalorder %s2222_s5, %s1873_s27  ;;  %p1876_p0 = scmp.lt.s32.totalorder %s1874_s14, %s1868_s13 }
  0x7a   : > { %v1719_v23 = vld [vmem:[#allocation7] sm:$0xff]   ;;  %v1720_v24 = vld [vmem:[#allocation8 + $0x38] sm:$0xff]   ;;  %v1721_v25 = vld [vmem:[#allocation8 + $0x30] sm:$0xff]   ;;  %p1871_p1 = pneg %p1870_p7 }
  0x7b   : > { %1512 = vmatpush3.bf16.msra.mxu1 %v1713_v8  ;;  %v1722_v26 = vld [vmem:[#allocation8 + $0x28] sm:$0xff]   ;;  %v1723_v27 = vld [vmem:[#allocation8 + $0x20] sm:$0xff]   ;;  %v1724_v28 = vld [vmem:[#allocation8 + $0x18] sm:$0xff]   ;;  %p1877_p11 = por %p1876_p0, %p1875_p13 }
  0x7c   : > { %1482 = vmatpush3.bf16.msra.mxu0 %v1698_v2  ;;  %1513 = vmatprep.subr.bf16.mxu1 %v1714_v10  ;;  %v1725_v29 = vld [vmem:[#allocation8 + $0x10] sm:$0xff]   ;;  %v1362_v32 = vld [vmem:[%s2269_s2] ss:$0 sm:$0xff] }
  0x7d   : > { %1483 = vmatprep.subr.bf16.mxu0 %v1699_v3  ;;  %p1878_p5 = pnand %p1877_p11, %p1871_p1 }
  0x7f   : > { %1514 = vmatpush3.bf16.msra.mxu1 %v1714_v10 }
  0x80   : > { %1484 = vmatpush3.bf16.msra.mxu0 %v1699_v3  ;;  %1515 = vmatprep.subr.bf16.mxu1 %v1715_v12 }
  0x81   : > { %1485 = vmatprep.subr.bf16.mxu0 %v1700_v5 }
  0x83   : > { %1516 = vmatpush3.bf16.msra.mxu1 %v1715_v12 }
  0x84   : > { %1486 = vmatpush3.bf16.msra.mxu0 %v1700_v5  ;;  %1517 = vmatprep.subr.bf16.mxu1 %v1716_v13 }
  0x85   : > { %1487 = vmatprep.subr.bf16.mxu0 %v1701_v6 }
  0x87   : > { %1518 = vmatpush3.bf16.msra.mxu1 %v1716_v13 }
  0x88   : > { %1488 = vmatpush3.bf16.msra.mxu0 %v1701_v6  ;;  %1519 = vmatprep.subr.bf16.mxu1 %v1717_v21 }
  0x89   : > { %1489 = vmatprep.subr.bf16.mxu0 %v1702_v9 }
  0x8b   : > { %1520 = vmatpush3.bf16.msra.mxu1 %v1717_v21 }
  0x8c   : > { %1490 = vmatpush3.bf16.msra.mxu0 %v1702_v9  ;;  %1521 = vmatprep.subr.bf16.mxu1 %v1718_v22 }
  0x8d   : > { %1491 = vmatprep.subr.bf16.mxu0 %v1703_v11 }
  0x8f   : > { %1522 = vmatpush3.bf16.msra.mxu1 %v1718_v22 }
  0x90   : > { %1492 = vmatpush3.bf16.msra.mxu0 %v1703_v11  ;;  %1523 = vmatprep.subr.bf16.mxu1 %v1719_v23 }
  0x91   : > { %1541 = vmatprep.subr.bf16.mxu0 %v1720_v24 }
  0x93   : > { %1494 = vmatmul.mubr.bf16.vlgmr.msra.gmra.mxu0 %v1705_v14  ;;  %1524 = vmatpush3.bf16.msra.mxu1 %v1719_v23  ;;  %v1726_v23 = vld [vmem:[#allocation8 + $0x8] sm:$0xff]  }
  0x94   : > { %1497 = vmatprep.mubr.bf16.mxu0 %v1706_v15  ;;  %1542 = vmatpush3.bf16.msra.mxu0 %v1720_v24  ;;  %v1727_v24 = vld [vmem:[#allocation8] sm:$0xff]  }
  0x95   : > { %1543 = vmatprep.subr.bf16.mxu0 %v1721_v25 }
  0x98   : > { %1544 = vmatpush3.bf16.msra.mxu0 %v1721_v25  ;;  %v1728_v25 = vld [vmem:[#allocation10 + $0x38] sm:$0xff]  }
  0x99   : > { %1545 = vmatprep.subr.bf16.mxu0 %v1722_v26  ;;  %1573 = vmatprep.subr.bf16.mxu1 %v1728_v25 }
  0x9b   : > { %1498 = vmatmul.mubr.bf16.gmra.mxu0 %v1707_v16 }
  0x9c   : > { %1501 = vmatprep.mubr.bf16.mxu0 %v1708_v17  ;;  %1546 = vmatpush3.bf16.msra.mxu0 %v1722_v26  ;;  %v1729_v26 = vld [vmem:[#allocation10 + $0x30] sm:$0xff]  }
  0x9d   : > { %1547 = vmatprep.subr.bf16.mxu0 %v1723_v27 }
  0xa0   : > { %1548 = vmatpush3.bf16.msra.mxu0 %v1723_v27  ;;  %v1730_v27 = vld [vmem:[#allocation10 + $0x28] sm:$0xff]  }
  0xa1   : > { %1549 = vmatprep.subr.bf16.mxu0 %v1724_v28 }
  0xa3   : > { %1502 = vmatmul.mubr.bf16.gmra.mxu0 %v1709_v18 }
  0xa4   : > { %1505 = vmatprep.mubr.bf16.mxu0 %v1710_v19  ;;  %1550 = vmatpush3.bf16.msra.mxu0 %v1724_v28  ;;  %v1731_v28 = vld [vmem:[#allocation10 + $0x20] sm:$0xff]  }
  0xa5   : > { %1551 = vmatprep.subr.bf16.mxu0 %v1725_v29 }
  0xa8   : > { %1552 = vmatpush3.bf16.msra.mxu0 %v1725_v29  ;;  %v1732_v29 = vld [vmem:[#allocation10 + $0x18] sm:$0xff]  }
  0xa9   : > { %1553 = vmatprep.subr.bf16.mxu0 %v1726_v23 }
  0xab   : > { %1506 = vmatmul.mubr.bf16.gmra.mxu0 %v1711_v20 }
  0xac   : > { %1554 = vmatpush3.bf16.msra.mxu0 %v1726_v23 }
  0xad   : > { %1555 = vmatprep.subr.bf16.mxu0 %v1727_v24 }
  0xb0   : > { %1556 = vmatpush3.bf16.msra.mxu0 %v1727_v24 }
 0x153   : > { %v1495_v30 = vpop.f32.mrf.mxu0 }
 0x154   : > { %v590_v36 = vadd.f32 %v1495_v30, %v1362_v32 }
 0x155   : > { %v581_v31 = vpop.f32.mrf.mxu0 }
 0x156   : > { %v582_v34 = vadd.f32 %v1362_v32, %v581_v31  ;;  %v646_v43 = vmax.f32 %v590_v36, 0.0 }
 0x157   : > { %v1496_v33 = vpop.f32.mrf.mxu0 }
 0x158   : > { %v593_v35 = vadd.f32 %v1496_v33, %v1362_v32  ;;  %v644_v41 = vmax.f32 %v582_v34, 0.0  ;;  %v1379_v33 = vld [vmem:[%s2271_s4] ss:$0 sm:$0xff] }
 0x159   : > { %v584_v37 = vpop.f32.mrf.mxu0 }
 0x15a   : > { %v585_v38 = vadd.f32 %v1362_v32, %v584_v37  ;;  %v647_v39 = vmax.f32 %v593_v35, 0.0 }
 0x15b   : > { %v1499_v40 = vpop.f32.mrf.mxu0 }
 0x15c   : > { %v645_v42 = vmax.f32 %v585_v38, 0.0  ;;  %v661_v46 = vpack.c.bf16 %v647_v39, %v646_v43  ;;  %v606_v50 = vadd.f32 %v1499_v40, %v1362_v32 }
 0x15d   : > { %v597_v44 = vpop.f32.mrf.mxu0 }
 0x15e   : > { %v660_v45 = vpack.c.bf16 %v645_v42, %v644_v41  ;;  %v598_v48 = vadd.f32 %v1362_v32, %v597_v44  ;;  %v650_v57 = vmax.f32 %v606_v50, 0.0 }
 0x15f   : > { %v1500_v47 = vpop.f32.mrf.mxu0 }
 0x160   : > { %v609_v49 = vadd.f32 %v1500_v47, %v1362_v32  ;;  %1525 = vmatprep.mubr.bf16.mxu1 %v660_v45  ;;  %v648_v55 = vmax.f32 %v598_v48, 0.0 }
 0x161   : > { %v600_v51 = vpop.f32.mrf.mxu0  ;;  %1526 = vmatmul.mubr.bf16.vlgmr.msra.gmra.mxu1 %v661_v46 }
 0x162   : > { %v601_v52 = vadd.f32 %v1362_v32, %v600_v51  ;;  %v651_v53 = vmax.f32 %v609_v49, 0.0  ;;  %1574 = vmatpush3.bf16.msra.mxu1 %v1728_v25 }
 0x163   : > { %v1503_v54 = vpop.f32.mrf.mxu0  ;;  %1575 = vmatprep.subr.bf16.mxu1 %v1729_v26 }
 0x164   : > { %v649_v56 = vmax.f32 %v601_v52, 0.0  ;;  %v663_v60 = vpack.c.bf16 %v651_v53, %v650_v57  ;;  %v622_v0 = vadd.f32 %v1503_v54, %v1362_v32 }
 0x165   : > { %v613_v58 = vpop.f32.mrf.mxu0 }
 0x166   : > { %v662_v59 = vpack.c.bf16 %v649_v56, %v648_v55  ;;  %v614_v62 = vadd.f32 %v1362_v32, %v613_v58  ;;  %v654_v7 = vmax.f32 %v622_v0, 0.0  ;;  %1576 = vmatpush3.bf16.msra.mxu1 %v1729_v26 }
 0x167   : > { %v1504_v61 = vpop.f32.mrf.mxu0  ;;  %1577 = vmatprep.subr.bf16.mxu1 %v1730_v27 }
 0x168   : > { %v625_v63 = vadd.f32 %v1504_v61, %v1362_v32  ;;  %1529 = vmatprep.mubr.bf16.mxu1 %v662_v59  ;;  %v652_v5 = vmax.f32 %v614_v62, 0.0 }
 0x169   : > { %v616_v1 = vpop.f32.mrf.mxu0  ;;  %1530 = vmatmul.mubr.bf16.gmra.mxu1 %v663_v60 }
 0x16a   : > { %v617_v2 = vadd.f32 %v1362_v32, %v616_v1  ;;  %v655_v3 = vmax.f32 %v625_v63, 0.0  ;;  %1578 = vmatpush3.bf16.msra.mxu1 %v1730_v27 }
 0x16b   : > { %v1507_v4 = vpop.f32.mrf.mxu0  ;;  %1579 = vmatprep.subr.bf16.mxu1 %v1731_v28 }
 0x16c   : > { %v653_v6 = vmax.f32 %v617_v2, 0.0  ;;  %v665_v10 = vpack.c.bf16 %v655_v3, %v654_v7  ;;  %v638_v14 = vadd.f32 %v1507_v4, %v1362_v32  ;;  %v1733_v7 = vld [vmem:[#allocation10 + $0x10] sm:$0xff]  }
 0x16d   : > { %v629_v8 = vpop.f32.mrf.mxu0 }
 0x16e   : > { %v664_v9 = vpack.c.bf16 %v653_v6, %v652_v5  ;;  %v630_v12 = vadd.f32 %v1362_v32, %v629_v8  ;;  %v658_v20 = vmax.f32 %v638_v14, 0.0  ;;  %1580 = vmatpush3.bf16.msra.mxu1 %v1731_v28  ;;  %v1734_v8 = vld [vmem:[#allocation10 + $0x8] sm:$0xff]  }
 0x16f   : > { %v1508_v11 = vpop.f32.mrf.mxu0  ;;  %1581 = vmatprep.subr.bf16.mxu1 %v1732_v29 }
 0x170   : > { %v641_v13 = vadd.f32 %v1508_v11, %v1362_v32  ;;  %1533 = vmatprep.mubr.bf16.mxu1 %v664_v9  ;;  %v656_v18 = vmax.f32 %v630_v12, 0.0  ;;  %v1735_v9 = vld [vmem:[#allocation10] sm:$0xff]  }
 0x171   : > { %v632_v15 = vpop.f32.mrf.mxu0  ;;  %1534 = vmatmul.mubr.bf16.gmra.mxu1 %v665_v10  ;;  %v1388_v12 = vld [vmem:[%s2273_s6] ss:$0 sm:$0xff] }
 0x172   : > { %v633_v16 = vadd.f32 %v1362_v32, %v632_v15  ;;  %v659_v17 = vmax.f32 %v641_v13, 0.0  ;;  %1582 = vmatpush3.bf16.msra.mxu1 %v1732_v29 }
 0x173   : > { %1583 = vmatprep.subr.bf16.mxu1 %v1733_v7 }
 0x174   : > { %v657_v19 = vmax.f32 %v633_v16, 0.0  ;;  %v667_v22 = vpack.c.bf16 %v659_v17, %v658_v20 }
 0x176   : > { %v666_v21 = vpack.c.bf16 %v657_v19, %v656_v18  ;;  %1584 = vmatpush3.bf16.msra.mxu1 %v1733_v7 }
 0x177   : > { %1585 = vmatprep.subr.bf16.mxu1 %v1734_v8 }
 0x178   : > { %1537 = vmatprep.mubr.bf16.mxu1 %v666_v21 }
 0x179   : > { %1538 = vmatmul.mubr.bf16.gmra.mxu1 %v667_v22 }
 0x17a   : > { %1586 = vmatpush3.bf16.msra.mxu1 %v1734_v8 }
 0x17b   : > { %1587 = vmatprep.subr.bf16.mxu1 %v1735_v9 }
 0x17e   : > { %1588 = vmatpush3.bf16.msra.mxu1 %v1735_v9 }
 0x221   : > { %v1527_v30 = vpop.f32.mrf.mxu1 }
 0x222   : > { %v782_v38 = vadd.f32 %v1527_v30, %v1379_v33 }
 0x223   : > { %v773_v31 = vpop.f32.mrf.mxu1 }
 0x224   : > { %v774_v36 = vadd.f32 %v1379_v33, %v773_v31 }
 0x225   : > { %v1528_v32 = vpop.f32.mrf.mxu1 }
 0x226   : > { %v785_v34 = vadd.f32 %v1528_v32, %v1379_v33 }
 0x227   : > { %v776_v35 = vpop.f32.mrf.mxu1 }
 0x228   : > { %v777_v37 = vadd.f32 %v1379_v33, %v776_v35  ;;  %v837_v41 = vpack.c.bf16 %v785_v34, %v782_v38 }
 0x229   : > { %v1531_v39 = vpop.f32.mrf.mxu1 }
 0x22a   : > { %v836_v40 = vpack.c.bf16 %v777_v37, %v774_v36  ;;  %v798_v48 = vadd.f32 %v1531_v39, %v1379_v33 }
 0x22b   : > { %v789_v42 = vpop.f32.mrf.mxu1 }
 0x22c   : > { %1557 = vmatprep.mubr.bf16.mxu0 %v836_v40  ;;  %v790_v46 = vadd.f32 %v1379_v33, %v789_v42 }
 0x22d   : > { %v1532_v43 = vpop.f32.mrf.mxu1  ;;  %1558 = vmatmul.mubr.bf16.vlgmr.msra.gmra.mxu0 %v837_v41 }
 0x22e   : > { %v801_v44 = vadd.f32 %v1532_v43, %v1379_v33 }
 0x22f   : > { %v792_v45 = vpop.f32.mrf.mxu1 }
 0x230   : > { %v793_v47 = vadd.f32 %v1379_v33, %v792_v45  ;;  %v839_v51 = vpack.c.bf16 %v801_v44, %v798_v48 }
 0x231   : > { %v1535_v49 = vpop.f32.mrf.mxu1 }
 0x232   : > { %v838_v50 = vpack.c.bf16 %v793_v47, %v790_v46  ;;  %v814_v58 = vadd.f32 %v1535_v49, %v1379_v33 }
 0x233   : > { %v805_v52 = vpop.f32.mrf.mxu1 }
 0x234   : > { %1561 = vmatprep.mubr.bf16.mxu0 %v838_v50  ;;  %v806_v56 = vadd.f32 %v1379_v33, %v805_v52 }
 0x235   : > { %v1536_v53 = vpop.f32.mrf.mxu1  ;;  %1562 = vmatmul.mubr.bf16.gmra.mxu0 %v839_v51 }
 0x236   : > { %v817_v54 = vadd.f32 %v1536_v53, %v1379_v33 }
 0x237   : > { %v808_v55 = vpop.f32.mrf.mxu1 }
 0x238   : > { %v809_v57 = vadd.f32 %v1379_v33, %v808_v55  ;;  %v841_v61 = vpack.c.bf16 %v817_v54, %v814_v58 }
 0x239   : > { %v1539_v59 = vpop.f32.mrf.mxu1 }
 0x23a   : > { %v840_v60 = vpack.c.bf16 %v809_v57, %v806_v56  ;;  %v830_v4 = vadd.f32 %v1539_v59, %v1379_v33 }
 0x23b   : > { %v821_v62 = vpop.f32.mrf.mxu1 }
 0x23c   : > { %1565 = vmatprep.mubr.bf16.mxu0 %v840_v60  ;;  %v822_v2 = vadd.f32 %v1379_v33, %v821_v62 }
 0x23d   : > { %v1540_v63 = vpop.f32.mrf.mxu1  ;;  %1566 = vmatmul.mubr.bf16.gmra.mxu0 %v841_v61 }
 0x23e   : > { %v833_v0 = vadd.f32 %v1540_v63, %v1379_v33 }
 0x23f   : > { %v824_v1 = vpop.f32.mrf.mxu1 }
 0x240   : > { %v825_v3 = vadd.f32 %v1379_v33, %v824_v1  ;;  %v843_v6 = vpack.c.bf16 %v833_v0, %v830_v4 }
 0x242   : > { %v842_v5 = vpack.c.bf16 %v825_v3, %v822_v2  ;;  %v1397_v3 = vld [vmem:[%s2275_s8] ss:$0 sm:$0xff] }
 0x244   : > { %1569 = vmatprep.mubr.bf16.mxu0 %v842_v5 }
 0x245   : > { %1570 = vmatmul.mubr.bf16.gmra.mxu0 %v843_v6 }
 0x2ed   : > { %v1559_v10 = vpop.f32.mrf.mxu0 }
 0x2ee   : > { %v958_v16 = vadd.f32 %v1559_v10, %v1388_v12 }
 0x2ef   : > { %v949_v11 = vpop.f32.mrf.mxu0 }
 0x2f0   : > { %v950_v14 = vadd.f32 %v1388_v12, %v949_v11  ;;  %v1014_v23 = vmax.f32 %v958_v16, 0.0 }
 0x2f1   : > { %v1560_v13 = vpop.f32.mrf.mxu0 }
 0x2f2   : > { %v961_v15 = vadd.f32 %v1560_v13, %v1388_v12  ;;  %v1012_v21 = vmax.f32 %v950_v14, 0.0 }
 0x2f3   : > { %v952_v17 = vpop.f32.mrf.mxu0 }
 0x2f4   : > { %v953_v18 = vadd.f32 %v1388_v12, %v952_v17  ;;  %v1015_v19 = vmax.f32 %v961_v15, 0.0 }
 0x2f5   : > { %v1563_v20 = vpop.f32.mrf.mxu0 }
 0x2f6   : > { %v1013_v22 = vmax.f32 %v953_v18, 0.0  ;;  %v1029_v26 = vpack.c.bf16 %v1015_v19, %v1014_v23  ;;  %v974_v30 = vadd.f32 %v1563_v20, %v1388_v12 }
 0x2f7   : > { %v965_v24 = vpop.f32.mrf.mxu0 }
 0x2f8   : > { %v1028_v25 = vpack.c.bf16 %v1013_v22, %v1012_v21  ;;  %v966_v28 = vadd.f32 %v1388_v12, %v965_v24  ;;  %v1018_v37 = vmax.f32 %v974_v30, 0.0 }
 0x2f9   : > { %v1564_v27 = vpop.f32.mrf.mxu0 }
 0x2fa   : > { %v977_v29 = vadd.f32 %v1564_v27, %v1388_v12  ;;  %1589 = vmatprep.mubr.bf16.mxu1 %v1028_v25  ;;  %v1016_v35 = vmax.f32 %v966_v28, 0.0 }
 0x2fb   : > { %v968_v31 = vpop.f32.mrf.mxu0  ;;  %1590 = vmatmul.mubr.bf16.vlgmr.msra.gmra.mxu1 %v1029_v26 }
 0x2fc   : > { %v969_v32 = vadd.f32 %v1388_v12, %v968_v31  ;;  %v1019_v33 = vmax.f32 %v977_v29, 0.0 }
 0x2fd   : > { %v1567_v34 = vpop.f32.mrf.mxu0 }
 0x2fe   : > { %v1017_v36 = vmax.f32 %v969_v32, 0.0  ;;  %v1031_v40 = vpack.c.bf16 %v1019_v33, %v1018_v37  ;;  %v990_v44 = vadd.f32 %v1567_v34, %v1388_v12 }
 0x2ff   : > { %v981_v38 = vpop.f32.mrf.mxu0 }
 0x300   : > { %v1030_v39 = vpack.c.bf16 %v1017_v36, %v1016_v35  ;;  %v982_v42 = vadd.f32 %v1388_v12, %v981_v38  ;;  %v1022_v51 = vmax.f32 %v990_v44, 0.0 }
 0x301   : > { %v1568_v41 = vpop.f32.mrf.mxu0 }
 0x302   : > { %v993_v43 = vadd.f32 %v1568_v41, %v1388_v12  ;;  %1593 = vmatprep.mubr.bf16.mxu1 %v1030_v39  ;;  %v1020_v49 = vmax.f32 %v982_v42, 0.0 }
 0x303   : > { %v984_v45 = vpop.f32.mrf.mxu0  ;;  %1594 = vmatmul.mubr.bf16.gmra.mxu1 %v1031_v40 }
 0x304   : > { %v985_v46 = vadd.f32 %v1388_v12, %v984_v45  ;;  %v1023_v47 = vmax.f32 %v993_v43, 0.0 }
 0x305   : > { %v1571_v48 = vpop.f32.mrf.mxu0 }
 0x306   : > { %v1021_v50 = vmax.f32 %v985_v46, 0.0  ;;  %v1033_v54 = vpack.c.bf16 %v1023_v47, %v1022_v51  ;;  %v1006_v58 = vadd.f32 %v1571_v48, %v1388_v12 }
 0x307   : > { %v997_v52 = vpop.f32.mrf.mxu0 }
 0x308   : > { %v1032_v53 = vpack.c.bf16 %v1021_v50, %v1020_v49  ;;  %v998_v56 = vadd.f32 %v1388_v12, %v997_v52  ;;  %v1026_v0 = vmax.f32 %v1006_v58, 0.0 }
 0x309   : > { %v1572_v55 = vpop.f32.mrf.mxu0 }
 0x30a   : > { %v1009_v57 = vadd.f32 %v1572_v55, %v1388_v12  ;;  %1597 = vmatprep.mubr.bf16.mxu1 %v1032_v53  ;;  %v1024_v62 = vmax.f32 %v998_v56, 0.0 }
 0x30b   : > { %v1000_v59 = vpop.f32.mrf.mxu0  ;;  %1598 = vmatmul.mubr.bf16.gmra.mxu1 %v1033_v54 }
 0x30c   : > { %v1001_v60 = vadd.f32 %v1388_v12, %v1000_v59  ;;  %v1027_v61 = vmax.f32 %v1009_v57, 0.0 }
 0x30e   : > { %v1025_v63 = vmax.f32 %v1001_v60, 0.0  ;;  %v1035_v2 = vpack.c.bf16 %v1027_v61, %v1026_v0 }
 0x310   : > { %v1034_v1 = vpack.c.bf16 %v1025_v63, %v1024_v62 }
 0x312   : > { %1601 = vmatprep.mubr.bf16.mxu1 %v1034_v1 }
 0x313   : > { %1602 = vmatmul.mubr.bf16.gmra.mxu1 %v1035_v2 }
 0x3bb   : > { %v1591_v4 = vpop.f32.mrf.mxu1 }
 0x3bc   : > { %v1150_v5 = vadd.f32 %v1591_v4, %v1397_v3 }
 0x3bd   : > { %v1141_v6 = vpop.f32.mrf.mxu1 }
 0x3be   : > { %1206 = vst [vmem:[%s2199_s1 + $0x10] sm:$0xff] %v1150_v5  ;;  %v1142_v7 = vadd.f32 %v1397_v3, %v1141_v6 }
 0x3bf   : > { %v1592_v8 = vpop.f32.mrf.mxu1 }
 0x3c0   : > { %1204 = vst [vmem:[%s2199_s1] sm:$0xff] %v1142_v7  ;;  %v1153_v9 = vadd.f32 %v1592_v8, %v1397_v3 }
 0x3c1   : > { %v1144_v10 = vpop.f32.mrf.mxu1 }
 0x3c2   : > { %1207 = vst [vmem:[%s2199_s1 + $0x18] sm:$0xff] %v1153_v9  ;;  %v1145_v11 = vadd.f32 %v1397_v3, %v1144_v10 }
 0x3c3   : > { %v1595_v12 = vpop.f32.mrf.mxu1 }
 0x3c4   : > { %1205 = vst [vmem:[%s2199_s1 + $0x8] sm:$0xff] %v1145_v11  ;;  %v1166_v13 = vadd.f32 %v1595_v12, %v1397_v3 }
 0x3c5   : > { %v1157_v14 = vpop.f32.mrf.mxu1 }
 0x3c6   : > { %1210 = vst [vmem:[%s2199_s1 + $0x30] sm:$0xff] %v1166_v13  ;;  %v1158_v15 = vadd.f32 %v1397_v3, %v1157_v14 }
 0x3c7   : > { %v1596_v16 = vpop.f32.mrf.mxu1 }
 0x3c8   : > { %1208 = vst [vmem:[%s2199_s1 + $0x20] sm:$0xff] %v1158_v15  ;;  %v1169_v17 = vadd.f32 %v1596_v16, %v1397_v3 }
 0x3c9   : > { %v1160_v18 = vpop.f32.mrf.mxu1 }
 0x3ca   : > { %1211 = vst [vmem:[%s2199_s1 + $0x38] sm:$0xff] %v1169_v17  ;;  %v1161_v19 = vadd.f32 %v1397_v3, %v1160_v18 }
 0x3cb   : > { %v1599_v20 = vpop.f32.mrf.mxu1 }
 0x3cc   : > { %1209 = vst [vmem:[%s2199_s1 + $0x28] sm:$0xff] %v1161_v19  ;;  %v1182_v21 = vadd.f32 %v1599_v20, %v1397_v3 }
 0x3cd   : > { %v1173_v22 = vpop.f32.mrf.mxu1 }
 0x3ce   : > { %1214 = vst [vmem:[%s2199_s1 + $0x50] sm:$0xff] %v1182_v21  ;;  %v1174_v23 = vadd.f32 %v1397_v3, %v1173_v22 }
 0x3cf   : > { %v1600_v24 = vpop.f32.mrf.mxu1 }
 0x3d0   : > { %1212 = vst [vmem:[%s2199_s1 + $0x40] sm:$0xff] %v1174_v23  ;;  %v1185_v25 = vadd.f32 %v1600_v24, %v1397_v3 }
 0x3d1   : > { %v1176_v26 = vpop.f32.mrf.mxu1 }
 0x3d2   : > { %1215 = vst [vmem:[%s2199_s1 + $0x58] sm:$0xff] %v1185_v25  ;;  %v1177_v27 = vadd.f32 %v1397_v3, %v1176_v26 }
 0x3d3   : > { %v1603_v28 = vpop.f32.mrf.mxu1 }
 0x3d4   : > { %1213 = vst [vmem:[%s2199_s1 + $0x48] sm:$0xff] %v1177_v27  ;;  %v1198_v29 = vadd.f32 %v1603_v28, %v1397_v3 }
 0x3d5   : > { %v1189_v30 = vpop.f32.mrf.mxu1 }
 0x3d6   : > { %1218 = vst [vmem:[%s2199_s1 + $0x70] sm:$0xff] %v1198_v29  ;;  %v1190_v31 = vadd.f32 %v1397_v3, %v1189_v30 }
 0x3d7   : > { %v1604_v32 = vpop.f32.mrf.mxu1 }
 0x3d8   : > { %1216 = vst [vmem:[%s2199_s1 + $0x60] sm:$0xff] %v1190_v31  ;;  %v1201_v33 = vadd.f32 %v1604_v32, %v1397_v3 }
 0x3d9   : > { %v1192_v34 = vpop.f32.mrf.mxu1 }
 0x3da   : > { %1219 = vst [vmem:[%s2199_s1 + $0x78] sm:$0xff] %v1201_v33  ;;  %v1193_v35 = vadd.f32 %v1397_v3, %v1192_v34 }
 0x3dc   : > { %1217 = vst [vmem:[%s2199_s1 + $0x68] sm:$0xff] %v1193_v35 }
 0x3dd   : > { %1881 = shalt.err (!%p1878_p5)
}
 0x3de   : > { %s1882_s20 = scalar_lea.hbm %s2220_s15, 2048  ;;  %s1886_s28 = scalar_lea.hbm %s2276_s9, 4096 }
 0x3df   : > { %p1883_p6 = scmp.ne.s32.totalorder %s2220_s15, %s1882_s20  ;;  %p1887_p9 = scmp.lt.s32.totalorder %s2220_s15, %s2276_s9 }
 0x3e0   : > { %p1888_p2 = scmp.lt.s32.totalorder %s1886_s28, %s1882_s20 }
 0x3e1   : > { %p1884_p4 = pnand %p1883_p6, %p2303_p12 }
 0x3e2   : > { %p1889_p3 = por %p1888_p2, %p1887_p9 }
 0x3e3   : > { %p1885_p8 = pneg %p1884_p4 }
 0x3e5   : > { %p1890_p10 = pnand %p1889_p3, %p1885_p8 }
 0x3e7   : > { %1893 = shalt.err (!%p1890_p10)
}
 0x3e8   : > { %s1950_s22 = smov 128   ;;  %s1951_s24 = smov 8  }
 0x3e9   : > { %1623 = dma.vmem_to_hbm [thread:$0]  (%p2303_p12), %s2222_s5, 2048, %s2220_s15, %s1221_s17, %s1950_s22, %s1950_s22, %s1951_s24  }
 0x3ea PF: > { %s1249_s13 = sand.u32 1, %s1928_s30   ;;  %p2304_p7 = scmp.ne.s32.totalorder %s2287_s16, 0 }
 0x3eb   : > { %p2305_p1 = scmp.ge.s32.totalorder %s1940_s12, 2  ;;  %s1250_s26 = scalar_lea.sflag [#allocation4], %s1249_s13 }
 0x3ed   : > { %p1643_p13 = pnand %p2305_p1, %p2304_p7 }
 0x3ef   : > { %p1644_p0 = pneg %p1643_p13 }
 0x3f1   : > { %1923 = dma.done.wait (%p1644_p0), %s1250_s26, 2048  }
 0x3f2   : > { %1925 = vsyncadd (%p1644_p0), %s1250_s26, 4294965248  ;;  %p24_p11 = scmp.ge.s32.totalorder %s2102_s18, 4   ;;  %s2306_s30 = smov %s1932_s10 }
 0x3f3   : > { %s2307_s10 = smov %s1936_s11  ;;  %s2308_s11 = smov %s2118_s23 }
 0x3f4   : > { %s2309_s12 = smov %s2102_s18  ;;  %26 = sbr.rel (!%p24_p11) target bundleno = 11 (0xb), region = 117 }
 0x3f9   :  { %1255 = vsyncpa [#allocation3], 1 }
 0x3fa   :  { %1257 = vsyncpa [#allocation3 + $0x1], 1 }
 0x3fb   :  { %1258 = vsyncpa [#allocation6], 1 }
 0x3fc   :  { %1259 = vsyncpa [#allocation9], 1 }
 0x3fd   :  { %1260 = vsyncpa [#allocation4], 1 }
 0x3fe   :  { %1262 = vsyncpa [#allocation4 + $0x1], 1 }

// kernel: tpu_custom_call.1
= control target key start
LH: loop header
LB: loop body
LE: loop exit
PB: predicated region body
PF: predicated region fallthrough
CT: control target
= control target key end

     0   :  { %s2267_s0 = inlined_call_operand.hbm [shape: bf16[256,128], index: 0, kind: input, shape index: {}]   ;;  %s2268_s1 = inlined_call_operand.hbm [shape: bf16[128,128], index: 1, kind: input, shape index: {}]   ;;  %s2269_s2 = inlined_call_operand.vmem [shape: f32[1,128], index: 2, kind: input, shape index: {}]   ;;  %s2270_s3 = inlined_call_operand.hbm [shape: bf16[128,128], index: 3, kind: input, shape index: {}]   ;;  %s2271_s4 = inlined_call_operand.vmem [shape: f32[1,128], index: 4, kind: input, shape index: {}]   ;;  %s2272_s5 = inlined_call_operand.hbm [shape: bf16[128,128], index: 5, kind: input, shape index: {}]   ;;  %s2273_s6 = inlined_call_operand.vmem [shape: f32[1,128], index: 6, kind: input, shape index: {}]   ;;  %s2274_s7 = inlined_call_operand.hbm [shape: bf16[128,128], index: 7, kind: input, shape index: {}]   ;;  %s2275_s8 = inlined_call_operand.vmem [shape: f32[1,128], index: 8, kind: input, shape index: {}]   ;;  %s2276_s9 = inlined_call_operand.hbm [shape: f32[256,128], index: 9, kind: output, shape index: {}]  }
   0x1   :  { %2283 = sst [smem:[#allocation16_spill]] %s2268_s1 }
   0x2   :  { %2284 = sst [smem:[#allocation17_spill]] %s2270_s3 }
   0x3   :  { %2285 = sst [smem:[#allocation18_spill]] %s2272_s5 }
   0x4   :  { %14 = vsyncpa [#allocation3], 0 }
   0x5   :  { %16 = vsyncpa [#allocation3 + $0x1], 0 }
   0x6   :  { %17 = vsyncpa [#allocation6], 0 }
   0x7   :  { %18 = vsyncpa [#allocation9], 0 }
   0x8   :  { %19 = vsyncpa [#allocation4], 0 }
   0x9   :  { %21 = vsyncpa [#allocation4 + $0x1], 0  ;;  %s2002_s30 = smov 0   ;;  %s2004_s10 = smov 0  }
   0xa   :  { %s2006_s11 = smov 0   ;;  %s2008_s12 = smov 0  }
   0xb LB: > { %s2023_s13 = sadd.s32 4294967295, %s1940_s12   ;;  %s1345_s14 = sadd.s32 4294967294, %s1940_s12   ;;  %s1940_s12 = sphi %s2008_s12, %s2309_s12   ;;  %s1936_s11 = sphi %s2006_s11, %s2308_s11   ;;  %s1932_s10 = sphi %s2004_s10, %s2307_s10   ;;  %s1928_s30 = sphi %s2002_s30, %s2306_s30  }
   0xc   : > { %p47_p0 = scmp.ne.s32.totalorder %s1932_s10, %s1928_s30  ;;  %p2277_p1 = scmp.eq.s32.totalorder %s2023_s13, 0 }
   0xd   : > { %p239_p2 = scmp.eq.s32.totalorder %s2023_s13, 1  ;;  %p245_p3 = scmp.eq.s32.totalorder %s1345_s14, 1 }
   0xe   : > { %p2032_p4 = por %p2277_p1, %p47_p0  ;;  %p1346_p5 = scmp.ge.s32.totalorder %s1940_s12, 1 }
   0xf   : > { %p2037_p6 = por %p245_p3, %p47_p0  ;;  %p252_p7 = scmp.lt.s32.totalorder %s1940_s12, 3 }
  0x10   : > { %s2286_s15 = scalar_select %p2032_p4, 1, 0 }
  0x11   : > { %s2287_s16 = scalar_select %p2037_p6, 1, 0 }
  0x12   : > { %p2042_p8 = pnand %p1346_p5, %p252_p7  ;;  %s1942_s18 = smov [#allocation5]  }
  0x13   : > { %s264_s19 = sshll.u32 %s1942_s18, 4  ;;  %s1943_s21 = smov [#allocation8]   ;;  %s265_s19 = int_to_ptr.vmem [resolvable:$true] %s264_s19 }
  0x14   : > { %s2288_s17 = scalar_select %p2042_p8, 1, 0 }
  0x15   : > { %p1625_p9 = pneg %p2042_p8  ;;  %s296_s22 = sshll.u32 %s1943_s21, 4  ;;  %s297_s22 = int_to_ptr.vmem [resolvable:$true] %s296_s22 }
  0x16   : > { %s1944_s23 = smov [#allocation7]   ;;  %s1747_s25 = scalar_lea.vmem %s265_s19, 1024 }
  0x17   : > { %p2051_p11 = pnand %p1625_p9, %p2277_p1  ;;  %s280_s24 = sshll.u32 %s1944_s23, 4  ;;  %s281_s24 = int_to_ptr.vmem [resolvable:$true] %s280_s24 }
  0x18   : > { %p1748_p13 = scmp.ne.s32.totalorder %s265_s19, %s1747_s25  ;;  %p1755_p5 = scmp.lt.s32.totalorder %s265_s19, %s265_s19 }
  0x19   : > { %p1738_p12 = pneg %p2051_p11  ;;  %p1756_p7 = scmp.lt.s32.totalorder %s1747_s25, %s1747_s25 }
  0x1b   : > { %p1750_p0 = pnand %p1748_p13, %p1738_p12  ;;  %p1757_p9 = por %p1756_p7, %p1755_p5 }
  0x1d   : > { %p1751_p3 = pneg %p1750_p0 }
  0x1f   : > { %p1758_p10 = pnand %p1757_p9, %p1751_p3 }
  0x21   : > { %1761 = shalt.err (!%p1758_p10)
}
  0x22   : > { %s2278_s26 = smov 64   ;;  %s2279_s27 = smov 4  }
  0x23   : > { %s2290_s1 = sld [smem:[#allocation16_spill]]  ;;  %s1773_s14 = scalar_lea.vmem %s297_s22, 1024 }
  0x24   : > { %p1774_p13 = scmp.ne.s32.totalorder %s297_s22, %s1773_s14  ;;  %p1781_p3 = scmp.lt.s32.totalorder %s297_s22, %s297_s22 }
  0x25   : > { %p1782_p10 = scmp.lt.s32.totalorder %s1773_s14, %s1773_s14 }
  0x26   : > { %p1776_p0 = pnand %p1774_p13, %p1738_p12 }
  0x27   : > { %p1783_p7 = por %p1782_p10, %p1781_p3 }
  0x28   : > { %p1777_p5 = pneg %p1776_p0 }
  0x29   : > { %1628 = dma.hbm_to_vmem [thread:$0]  (!%p2051_p11), %s2290_s1, 1024, %s265_s19, [#allocation6], %s2278_s26, %s2278_s26, %s2279_s27  }
  0x2a   : > { %p1784_p9 = pnand %p1783_p7, %p1777_p5 }
  0x2c   : > { %1787 = shalt.err (!%p1784_p9)
}
  0x2d   : > { %s2291_s5 = sld [smem:[#allocation18_spill]]  ;;  %s1799_s19 = scalar_lea.vmem %s281_s24, 1024 }
  0x2e   : > { %p1800_p1 = scmp.ne.s32.totalorder %s281_s24, %s1799_s19  ;;  %p1807_p3 = scmp.lt.s32.totalorder %s281_s24, %s281_s24 }
  0x2f   : > { %p1808_p5 = scmp.lt.s32.totalorder %s1799_s19, %s1799_s19 }
  0x30   : > { %p1802_p13 = pnand %p1800_p1, %p1738_p12 }
  0x31   : > { %p1809_p10 = por %p1808_p5, %p1807_p3 }
  0x32   : > { %p1803_p0 = pneg %p1802_p13 }
  0x33   : > { %1634 = dma.hbm_to_vmem [thread:$0]  (!%p2051_p11), %s2291_s5, 1024, %s297_s22, [#allocation9], %s2278_s26, %s2278_s26, %s2279_s27  }
  0x34   : > { %p1810_p7 = pnand %p1809_p10, %p1803_p0 }
  0x36   : > { %1813 = shalt.err (!%p1810_p7)
}
  0x37   : > { %s2292_s3 = sld [smem:[#allocation17_spill]]  ;;  %s1947_s22 = smov [#allocation10]  }
  0x38   : > { %s312_s28 = sshll.u32 %s1947_s22, 4  ;;  %s313_s28 = int_to_ptr.vmem [resolvable:$true] %s312_s28 }
  0x39   : > { %s1825_s29 = scalar_lea.vmem %s313_s28, 1024  ;;  %p1833_p0 = scmp.lt.s32.totalorder %s313_s28, %s313_s28 }
  0x3a   : > { %p1826_p1 = scmp.ne.s32.totalorder %s313_s28, %s1825_s29  ;;  %p1834_p3 = scmp.lt.s32.totalorder %s1825_s29, %s1825_s29 }
  0x3c   : > { %p1828_p9 = pnand %p1826_p1, %p1738_p12  ;;  %p1835_p5 = por %p1834_p3, %p1833_p0 }
  0x3d   : > { %1631 = dma.hbm_to_vmem [thread:$0]  (!%p2051_p11), %s2292_s3, 1024, %s281_s24, [#allocation6], %s2278_s26, %s2278_s26, %s2279_s27  }
  0x3e   : > { %p1829_p13 = pneg %p1828_p9 }
  0x40   : > { %p1836_p10 = pnand %p1835_p5, %p1829_p13 }
  0x42   : > { %1839 = shalt.err (!%p1836_p10)
}
  0x43   : > { %1637 = dma.hbm_to_vmem [thread:$0]  (!%p2051_p11), %s2274_s7, 1024, %s313_s28, [#allocation9], %s2278_s26, %s2278_s26, %s2279_s27  }
  0x44   : > { %s2102_s18 = sadd.s32 1, %s1940_s12   ;;  %s34_s20 = sadd.s32 1, %s1936_s11 }
  0x45   : > { %s31_s21 = ssub.s32 %s1940_s12, %s2102_s18  ;;  %p41_p12 = scmp.ne.s32.totalorder %s1936_s11, %s1932_s10 }
  0x46   : > { %p32_p7 = scmp.eq.s32.totalorder %s31_s21, 0  ;;  %p42_p1 = scmp.eq.s32.totalorder %s1940_s12, 0 }
  0x47   : > { %p2112_p9 = por %p239_p2, %p41_p12  ;;  %p1650_p13 = scmp.lt.s32.totalorder %s1940_s12, 2 }
  0x48   : > { %s2118_s23 = scalar_select %p32_p7, %s1936_s11, %s34_s20  }
  0x49   : > { %s2293_s19 = scalar_select %p2112_p9, 1, 0 }
  0x4a   : > { %p43_p0 = por %p42_p1, %p41_p12  ;;  %s329_s25 = sand.u32 1, %s1936_s11  }
  0x4b   : > { %s1352_s22 = sshll.u32 %s329_s25, 6  ;;  %s1411_s28 = sshll.u32 %s1940_s12, 10 }
  0x4c   : > { %s2125_s14 = scalar_lea.hbm %s2267_s0, %s1411_s28  ;;  %s333_s21 = scalar_lea.vmem [#allocation2], %s1352_s22 }
  0x4d   : > { %s340_s26 = sshll.u32 %s333_s21, 4  ;;  %p2129_p2 = pnand %p1650_p13, %p43_p0  ;;  %s2127_s26 = int_to_ptr.vmem [resolvable:$true] %s340_s26 }
  0x4e   : > { %s2133_s20 = scalar_lea.sflag [#allocation3], %s329_s25  ;;  %s1840_s1 = scalar_lea.hbm %s2125_s14, 1024 }
  0x4f   : > { %p1841_p11 = scmp.ne.s32.totalorder %s2125_s14, %s1840_s1  ;;  %p1842_p3 = pneg %p2129_p2 }
  0x50   : > { %s1845_s22 = scalar_lea.hbm %s2267_s0, 2048  ;;  %p1846_p12 = scmp.lt.s32.totalorder %s2125_s14, %s2267_s0 }
  0x51   : > { %p1843_p5 = pnand %p1842_p3, %p1841_p11  ;;  %p1847_p7 = scmp.lt.s32.totalorder %s1845_s22, %s1840_s1 }
  0x53   : > { %p1844_p10 = pneg %p1843_p5  ;;  %p1848_p1 = por %p1847_p7, %p1846_p12 }
  0x55   : > { %p1849_p13 = pnand %p1848_p1, %p1844_p10 }
  0x57   : > { %1852 = shalt.err (!%p1849_p13)
}
  0x58   : > { %s1853_s25 = scalar_lea.vmem %s2127_s26, 1024  ;;  %s1948_s3 = smov [#allocation2]  }
  0x59   : > { %p1854_p0 = scmp.ne.s32.totalorder %s2127_s26, %s1853_s25  ;;  %s1858_s5 = sshll.u32 %s1948_s3, 4  ;;  %s1859_s5 = int_to_ptr.vmem [resolvable:$false] %s1858_s5 }
  0x5a   : > { %s1860_s28 = scalar_lea.vmem %s1859_s5, 2048  ;;  %p1861_p5 = scmp.lt.s32.totalorder %s2127_s26, %s1859_s5 }
  0x5b   : > { %p1856_p6 = pnand %p1854_p0, %p1842_p3  ;;  %p1862_p9 = scmp.lt.s32.totalorder %s1860_s28, %s1853_s25 }
  0x5d   : > { %p1857_p11 = pneg %p1856_p6  ;;  %p1863_p4 = por %p1862_p9, %p1861_p5 }
  0x5f   : > { %p1864_p8 = pnand %p1863_p4, %p1857_p11 }
  0x61   : > { %1867 = shalt.err (!%p1864_p8)
}
  0x62   : > { %s2295_s1 = smov 4   ;;  %s2296_s29 = smov 64  }
  0x63   : > { %1641 = dma.hbm_to_vmem [thread:$0]  (!%p2129_p2), %s2125_s14, 1024, %s2127_s26, %s2133_s20, %s2296_s29, %s2296_s29, %s2295_s1  }
  0x64   : > { %p2297_p6 = scmp.ne.s32.totalorder %s2288_s17, 0 }
  0x65   : > { %s2160_s3 = sand.u32 (!%p2297_p6), 1, %s1932_s10   ;;  %p2298_p4 = scmp.ne.s32.totalorder (!%p2297_p6), %s2286_s15, 0 }
  0x66   : > { %352 = sbr.rel (%p2297_p6) target bundleno = 1002 (0x3ea), region = 56  ;;  %s1356_s5 = sshll.u32 (!%p2297_p6), %s2160_s3, 6 }
  0x67   : > { %s355_s22 = scalar_lea.sflag (!%p2297_p6), [#allocation3], %s2160_s3  ;;  %s2164_s24 = scalar_lea.vmem (!%p2297_p6), [#allocation2], %s1356_s5 }
  0x6b   : > { %1911 = dma.done.wait (%p2298_p4), %s355_s22, 1024  }
  0x6c   : > { %1913 = vsyncadd (%p2298_p4), %s355_s22, 4294966272  ;;  %p2299_p8 = scmp.eq.s32.totalorder %s2023_s13, 0 }
  0x6e   : > { %1915 = dma.done.wait (%p2299_p8), [#allocation6], 2048   ;;  %p2300_p9 = pmov %p2299_p8 }
  0x6f   : > { %p2301_p2 = pmov %p2299_p8 }
  0x70   : > { %1917 = vsyncadd (%p2300_p9), [#allocation6], 4294965248 }
  0x71   : > { %1919 = dma.done.wait (%p2301_p2), [#allocation9], 2048   ;;  %p2302_p3 = pmov %p2301_p2 }
  0x72   : > { %v1696_v0 = vld [vmem:[#allocation5 + $0x38] sm:$0xff]   ;;  %v1697_v1 = vld [vmem:[#allocation5 + $0x30] sm:$0xff]   ;;  %v1698_v2 = vld [vmem:[#allocation5 + $0x28] sm:$0xff]   ;;  %s1361_s21 = sshll.u32 %s2160_s3, 7  ;;  %s1412_s29 = sshll.u32 %s2023_s13, 11 }
  0x73   : > { %1921 = vsyncadd (%p2302_p3), [#allocation9], 4294965248  ;;  %1477 = vmatprep.subr.bf16.mxu0 %v1696_v0  ;;  %v1699_v3 = vld [vmem:[#allocation5 + $0x20] sm:$0xff]   ;;  %v1700_v5 = vld [vmem:[#allocation5 + $0x18] sm:$0xff]   ;;  %s2199_s1 = scalar_lea.vmem [#allocation11], %s1361_s21  ;;  %s2220_s15 = scalar_lea.hbm %s2276_s9, %s1412_s29 }
  0x74   : > { %1478 = vmatpush3.bf16.msra.mxu0 %v1696_v0  ;;  %v1704_v4 = vld [vmem:[%s2164_s24] sm:$0xff]   ;;  %v1701_v6 = vld [vmem:[#allocation5 + $0x10] sm:$0xff]   ;;  %v1712_v7 = vld [vmem:[#allocation7 + $0x38] sm:$0xff]   ;;  %s1234_s5 = sshll.u32 %s2199_s1, 4  ;;  %s1221_s17 = scalar_lea.sflag [#allocation4], %s2160_s3  ;;  %s2222_s5 = int_to_ptr.vmem [resolvable:$true] %s1234_s5 }
  0x75   : > { %1479 = vmatprep.subr.bf16.mxu0 %v1697_v1  ;;  %1493 = vmatprep.mubr.bf16.mxu0 %v1704_v4  ;;  %v1713_v8 = vld [vmem:[#allocation7 + $0x30] sm:$0xff]   ;;  %v1702_v9 = vld [vmem:[#allocation5 + $0x8] sm:$0xff]   ;;  %v1703_v11 = vld [vmem:[#allocation5] sm:$0xff]   ;;  %s1868_s13 = scalar_lea.vmem %s2222_s5, 2048  ;;  %p2303_p12 = scmp.ne.s32.totalorder %s2293_s19, 0 }
  0x76   : > { %1509 = vmatprep.subr.bf16.mxu1 %v1712_v7  ;;  %v1714_v10 = vld [vmem:[#allocation7 + $0x28] sm:$0xff]   ;;  %v1715_v12 = vld [vmem:[#allocation7 + $0x20] sm:$0xff]   ;;  %v1716_v13 = vld [vmem:[#allocation7 + $0x18] sm:$0xff]   ;;  %p1869_p10 = scmp.ne.s32.totalorder %s2222_s5, %s1868_s13  ;;  %s1949_s26 = smov [#allocation11]  }
  0x77   : > { %1510 = vmatpush3.bf16.msra.mxu1 %v1712_v7  ;;  %v1705_v14 = vld [vmem:[%s2164_s24 + $0x8] sm:$0xff]   ;;  %v1706_v15 = vld [vmem:[%s2164_s24 + $0x10] sm:$0xff]   ;;  %v1707_v16 = vld [vmem:[%s2164_s24 + $0x18] sm:$0xff]   ;;  %s1872_s27 = sshll.u32 %s1949_s26, 4  ;;  %s1873_s27 = int_to_ptr.vmem [resolvable:$false] %s1872_s27 }
  0x78   : > { %1480 = vmatpush3.bf16.msra.mxu0 %v1697_v1  ;;  %1511 = vmatprep.subr.bf16.mxu1 %v1713_v8  ;;  %v1708_v17 = vld [vmem:[%s2164_s24 + $0x20] sm:$0xff]   ;;  %v1709_v18 = vld [vmem:[%s2164_s24 + $0x28] sm:$0xff]   ;;  %v1710_v19 = vld [vmem:[%s2164_s24 + $0x30] sm:$0xff]   ;;  %p1870_p7 = pnand %p1869_p10, %p2303_p12  ;;  %s1874_s14 = scalar_lea.vmem %s1873_s27, 4096 }
  0x79   : > { %1481 = vmatprep.subr.bf16.mxu0 %v1698_v2  ;;  %v1711_v20 = vld [vmem:[%s2164_s24 + $0x38] sm:$0xff]   ;;  %v1717_v21 = vld [vmem:[#allocation7 + $0x10] sm:$0xff]   ;;  %v1718_v22 = vld [vmem:[#allocation7 + $0x8] sm:$0xff]   ;;  %p1875_p13 = scmp.lt.s32.totalorder %s2222_s5, %s1873_s27  ;;  %p1876_p0 = scmp.lt.s32.totalorder %s1874_s14, %s1868_s13 }
  0x7a   : > { %v1719_v23 = vld [vmem:[#allocation7] sm:$0xff]   ;;  %v1720_v24 = vld [vmem:[#allocation8 + $0x38] sm:$0xff]   ;;  %v1721_v25 = vld [vmem:[#allocation8 + $0x30] sm:$0xff]   ;;  %p1871_p1 = pneg %p1870_p7 }
  0x7b   : > { %1512 = vmatpush3.bf16.msra.mxu1 %v1713_v8  ;;  %v1722_v26 = vld [vmem:[#allocation8 + $0x28] sm:$0xff]   ;;  %v1723_v27 = vld [vmem:[#allocation8 + $0x20] sm:$0xff]   ;;  %v1724_v28 = vld [vmem:[#allocation8 + $0x18] sm:$0xff]   ;;  %p1877_p11 = por %p1876_p0, %p1875_p13 }
  0x7c   : > { %1482 = vmatpush3.bf16.msra.mxu0 %v1698_v2  ;;  %1513 = vmatprep.subr.bf16.mxu1 %v1714_v10  ;;  %v1725_v29 = vld [vmem:[#allocation8 + $0x10] sm:$0xff]   ;;  %v1362_v32 = vld [vmem:[%s2269_s2] ss:$0 sm:$0xff] }
  0x7d   : > { %1483 = vmatprep.subr.bf16.mxu0 %v1699_v3  ;;  %p1878_p5 = pnand %p1877_p11, %p1871_p1 }
  0x7f   : > { %1514 = vmatpush3.bf16.msra.mxu1 %v1714_v10 }
  0x80   : > { %1484 = vmatpush3.bf16.msra.mxu0 %v1699_v3  ;;  %1515 = vmatprep.subr.bf16.mxu1 %v1715_v12 }
  0x81   : > { %1485 = vmatprep.subr.bf16.mxu0 %v1700_v5 }
  0x83   : > { %1516 = vmatpush3.bf16.msra.mxu1 %v1715_v12 }
  0x84   : > { %1486 = vmatpush3.bf16.msra.mxu0 %v1700_v5  ;;  %1517 = vmatprep.subr.bf16.mxu1 %v1716_v13 }
  0x85   : > { %1487 = vmatprep.subr.bf16.mxu0 %v1701_v6 }
  0x87   : > { %1518 = vmatpush3.bf16.msra.mxu1 %v1716_v13 }
  0x88   : > { %1488 = vmatpush3.bf16.msra.mxu0 %v1701_v6  ;;  %1519 = vmatprep.subr.bf16.mxu1 %v1717_v21 }
  0x89   : > { %1489 = vmatprep.subr.bf16.mxu0 %v1702_v9 }
  0x8b   : > { %1520 = vmatpush3.bf16.msra.mxu1 %v1717_v21 }
  0x8c   : > { %1490 = vmatpush3.bf16.msra.mxu0 %v1702_v9  ;;  %1521 = vmatprep.subr.bf16.mxu1 %v1718_v22 }
  0x8d   : > { %1491 = vmatprep.subr.bf16.mxu0 %v1703_v11 }
  0x8f   : > { %1522 = vmatpush3.bf16.msra.mxu1 %v1718_v22 }
  0x90   : > { %1492 = vmatpush3.bf16.msra.mxu0 %v1703_v11  ;;  %1523 = vmatprep.subr.bf16.mxu1 %v1719_v23 }
  0x91   : > { %1541 = vmatprep.subr.bf16.mxu0 %v1720_v24 }
  0x93   : > { %1494 = vmatmul.mubr.bf16.vlgmr.msra.gmra.mxu0 %v1705_v14  ;;  %1524 = vmatpush3.bf16.msra.mxu1 %v1719_v23  ;;  %v1726_v23 = vld [vmem:[#allocation8 + $0x8] sm:$0xff]  }
  0x94   : > { %1497 = vmatprep.mubr.bf16.mxu0 %v1706_v15  ;;  %1542 = vmatpush3.bf16.msra.mxu0 %v1720_v24  ;;  %v1727_v24 = vld [vmem:[#allocation8] sm:$0xff]  }
  0x95   : > { %1543 = vmatprep.subr.bf16.mxu0 %v1721_v25 }
  0x98   : > { %1544 = vmatpush3.bf16.msra.mxu0 %v1721_v25  ;;  %v1728_v25 = vld [vmem:[#allocation10 + $0x38] sm:$0xff]  }
  0x99   : > { %1545 = vmatprep.subr.bf16.mxu0 %v1722_v26  ;;  %1573 = vmatprep.subr.bf16.mxu1 %v1728_v25 }
  0x9b   : > { %1498 = vmatmul.mubr.bf16.gmra.mxu0 %v1707_v16 }
  0x9c   : > { %1501 = vmatprep.mubr.bf16.mxu0 %v1708_v17  ;;  %1546 = vmatpush3.bf16.msra.mxu0 %v1722_v26  ;;  %v1729_v26 = vld [vmem:[#allocation10 + $0x30] sm:$0xff]  }
  0x9d   : > { %1547 = vmatprep.subr.bf16.mxu0 %v1723_v27 }
  0xa0   : > { %1548 = vmatpush3.bf16.msra.mxu0 %v1723_v27  ;;  %v1730_v27 = vld [vmem:[#allocation10 + $0x28] sm:$0xff]  }
  0xa1   : > { %1549 = vmatprep.subr.bf16.mxu0 %v1724_v28 }
  0xa3   : > { %1502 = vmatmul.mubr.bf16.gmra.mxu0 %v1709_v18 }
  0xa4   : > { %1505 = vmatprep.mubr.bf16.mxu0 %v1710_v19  ;;  %1550 = vmatpush3.bf16.msra.mxu0 %v1724_v28  ;;  %v1731_v28 = vld [vmem:[#allocation10 + $0x20] sm:$0xff]  }
  0xa5   : > { %1551 = vmatprep.subr.bf16.mxu0 %v1725_v29 }
  0xa8   : > { %1552 = vmatpush3.bf16.msra.mxu0 %v1725_v29  ;;  %v1732_v29 = vld [vmem:[#allocation10 + $0x18] sm:$0xff]  }
  0xa9   : > { %1553 = vmatprep.subr.bf16.mxu0 %v1726_v23 }
  0xab   : > { %1506 = vmatmul.mubr.bf16.gmra.mxu0 %v1711_v20 }
  0xac   : > { %1554 = vmatpush3.bf16.msra.mxu0 %v1726_v23 }
  0xad   : > { %1555 = vmatprep.subr.bf16.mxu0 %v1727_v24 }
  0xb0   : > { %1556 = vmatpush3.bf16.msra.mxu0 %v1727_v24 }
 0x153   : > { %v1495_v30 = vpop.f32.mrf.mxu0 }
 0x154   : > { %v590_v36 = vadd.f32 %v1495_v30, %v1362_v32 }
 0x155   : > { %v581_v31 = vpop.f32.mrf.mxu0 }
 0x156   : > { %v582_v34 = vadd.f32 %v1362_v32, %v581_v31  ;;  %v646_v43 = vmax.f32 %v590_v36, 0.0 }
 0x157   : > { %v1496_v33 = vpop.f32.mrf.mxu0 }
 0x158   : > { %v593_v35 = vadd.f32 %v1496_v33, %v1362_v32  ;;  %v644_v41 = vmax.f32 %v582_v34, 0.0  ;;  %v1379_v33 = vld [vmem:[%s2271_s4] ss:$0 sm:$0xff] }
 0x159   : > { %v584_v37 = vpop.f32.mrf.mxu0 }
 0x15a   : > { %v585_v38 = vadd.f32 %v1362_v32, %v584_v37  ;;  %v647_v39 = vmax.f32 %v593_v35, 0.0 }
 0x15b   : > { %v1499_v40 = vpop.f32.mrf.mxu0 }
 0x15c   : > { %v645_v42 = vmax.f32 %v585_v38, 0.0  ;;  %v661_v46 = vpack.c.bf16 %v647_v39, %v646_v43  ;;  %v606_v50 = vadd.f32 %v1499_v40, %v1362_v32 }
 0x15d   : > { %v597_v44 = vpop.f32.mrf.mxu0 }
 0x15e   : > { %v660_v45 = vpack.c.bf16 %v645_v42, %v644_v41  ;;  %v598_v48 = vadd.f32 %v1362_v32, %v597_v44  ;;  %v650_v57 = vmax.f32 %v606_v50, 0.0 }
 0x15f   : > { %v1500_v47 = vpop.f32.mrf.mxu0 }
 0x160   : > { %v609_v49 = vadd.f32 %v1500_v47, %v1362_v32  ;;  %1525 = vmatprep.mubr.bf16.mxu1 %v660_v45  ;;  %v648_v55 = vmax.f32 %v598_v48, 0.0 }
 0x161   : > { %v600_v51 = vpop.f32.mrf.mxu0  ;;  %1526 = vmatmul.mubr.bf16.vlgmr.msra.gmra.mxu1 %v661_v46 }
 0x162   : > { %v601_v52 = vadd.f32 %v1362_v32, %v600_v51  ;;  %v651_v53 = vmax.f32 %v609_v49, 0.0  ;;  %1574 = vmatpush3.bf16.msra.mxu1 %v1728_v25 }
 0x163   : > { %v1503_v54 = vpop.f32.mrf.mxu0  ;;  %1575 = vmatprep.subr.bf16.mxu1 %v1729_v26 }
 0x164   : > { %v649_v56 = vmax.f32 %v601_v52, 0.0  ;;  %v663_v60 = vpack.c.bf16 %v651_v53, %v650_v57  ;;  %v622_v0 = vadd.f32 %v1503_v54, %v1362_v32 }
 0x165   : > { %v613_v58 = vpop.f32.mrf.mxu0 }
 0x166   : > { %v662_v59 = vpack.c.bf16 %v649_v56, %v648_v55  ;;  %v614_v62 = vadd.f32 %v1362_v32, %v613_v58  ;;  %v654_v7 = vmax.f32 %v622_v0, 0.0  ;;  %1576 = vmatpush3.bf16.msra.mxu1 %v1729_v26 }
 0x167   : > { %v1504_v61 = vpop.f32.mrf.mxu0  ;;  %1577 = vmatprep.subr.bf16.mxu1 %v1730_v27 }
 0x168   : > { %v625_v63 = vadd.f32 %v1504_v61, %v1362_v32  ;;  %1529 = vmatprep.mubr.bf16.mxu1 %v662_v59  ;;  %v652_v5 = vmax.f32 %v614_v62, 0.0 }
 0x169   : > { %v616_v1 = vpop.f32.mrf.mxu0  ;;  %1530 = vmatmul.mubr.bf16.gmra.mxu1 %v663_v60 }
 0x16a   : > { %v617_v2 = vadd.f32 %v1362_v32, %v616_v1  ;;  %v655_v3 = vmax.f32 %v625_v63, 0.0  ;;  %1578 = vmatpush3.bf16.msra.mxu1 %v1730_v27 }
 0x16b   : > { %v1507_v4 = vpop.f32.mrf.mxu0  ;;  %1579 = vmatprep.subr.bf16.mxu1 %v1731_v28 }
 0x16c   : > { %v653_v6 = vmax.f32 %v617_v2, 0.0  ;;  %v665_v10 = vpack.c.bf16 %v655_v3, %v654_v7  ;;  %v638_v14 = vadd.f32 %v1507_v4, %v1362_v32  ;;  %v1733_v7 = vld [vmem:[#allocation10 + $0x10] sm:$0xff]  }
 0x16d   : > { %v629_v8 = vpop.f32.mrf.mxu0 }
 0x16e   : > { %v664_v9 = vpack.c.bf16 %v653_v6, %v652_v5  ;;  %v630_v12 = vadd.f32 %v1362_v32, %v629_v8  ;;  %v658_v20 = vmax.f32 %v638_v14, 0.0  ;;  %1580 = vmatpush3.bf16.msra.mxu1 %v1731_v28  ;;  %v1734_v8 = vld [vmem:[#allocation10 + $0x8] sm:$0xff]  }
 0x16f   : > { %v1508_v11 = vpop.f32.mrf.mxu0  ;;  %1581 = vmatprep.subr.bf16.mxu1 %v1732_v29 }
 0x170   : > { %v641_v13 = vadd.f32 %v1508_v11, %v1362_v32  ;;  %1533 = vmatprep.mubr.bf16.mxu1 %v664_v9  ;;  %v656_v18 = vmax.f32 %v630_v12, 0.0  ;;  %v1735_v9 = vld [vmem:[#allocation10] sm:$0xff]  }
 0x171   : > { %v632_v15 = vpop.f32.mrf.mxu0  ;;  %1534 = vmatmul.mubr.bf16.gmra.mxu1 %v665_v10  ;;  %v1388_v12 = vld [vmem:[%s2273_s6] ss:$0 sm:$0xff] }
 0x172   : > { %v633_v16 = vadd.f32 %v1362_v32, %v632_v15  ;;  %v659_v17 = vmax.f32 %v641_v13, 0.0  ;;  %1582 = vmatpush3.bf16.msra.mxu1 %v1732_v29 }
 0x173   : > { %1583 = vmatprep.subr.bf16.mxu1 %v1733_v7 }
 0x174   : > { %v657_v19 = vmax.f32 %v633_v16, 0.0  ;;  %v667_v22 = vpack.c.bf16 %v659_v17, %v658_v20 }
 0x176   : > { %v666_v21 = vpack.c.bf16 %v657_v19, %v656_v18  ;;  %1584 = vmatpush3.bf16.msra.mxu1 %v1733_v7 }
 0x177   : > { %1585 = vmatprep.subr.bf16.mxu1 %v1734_v8 }
 0x178   : > { %1537 = vmatprep.mubr.bf16.mxu1 %v666_v21 }
 0x179   : > { %1538 = vmatmul.mubr.bf16.gmra.mxu1 %v667_v22 }
 0x17a   : > { %1586 = vmatpush3.bf16.msra.mxu1 %v1734_v8 }
 0x17b   : > { %1587 = vmatprep.subr.bf16.mxu1 %v1735_v9 }
 0x17e   : > { %1588 = vmatpush3.bf16.msra.mxu1 %v1735_v9 }
 0x221   : > { %v1527_v30 = vpop.f32.mrf.mxu1 }
 0x222   : > { %v782_v38 = vadd.f32 %v1527_v30, %v1379_v33 }
 0x223   : > { %v773_v31 = vpop.f32.mrf.mxu1 }
 0x224   : > { %v774_v36 = vadd.f32 %v1379_v33, %v773_v31 }
 0x225   : > { %v1528_v32 = vpop.f32.mrf.mxu1 }
 0x226   : > { %v785_v34 = vadd.f32 %v1528_v32, %v1379_v33 }
 0x227   : > { %v776_v35 = vpop.f32.mrf.mxu1 }
 0x228   : > { %v777_v37 = vadd.f32 %v1379_v33, %v776_v35  ;;  %v837_v41 = vpack.c.bf16 %v785_v34, %v782_v38 }
 0x229   : > { %v1531_v39 = vpop.f32.mrf.mxu1 }
 0x22a   : > { %v836_v40 = vpack.c.bf16 %v777_v37, %v774_v36  ;;  %v798_v48 = vadd.f32 %v1531_v39, %v1379_v33 }
 0x22b   : > { %v789_v42 = vpop.f32.mrf.mxu1 }
 0x22c   : > { %1557 = vmatprep.mubr.bf16.mxu0 %v836_v40  ;;  %v790_v46 = vadd.f32 %v1379_v33, %v789_v42 }
 0x22d   : > { %v1532_v43 = vpop.f32.mrf.mxu1  ;;  %1558 = vmatmul.mubr.bf16.vlgmr.msra.gmra.mxu0 %v837_v41 }
 0x22e   : > { %v801_v44 = vadd.f32 %v1532_v43, %v1379_v33 }
 0x22f   : > { %v792_v45 = vpop.f32.mrf.mxu1 }
 0x230   : > { %v793_v47 = vadd.f32 %v1379_v33, %v792_v45  ;;  %v839_v51 = vpack.c.bf16 %v801_v44, %v798_v48 }
 0x231   : > { %v1535_v49 = vpop.f32.mrf.mxu1 }
 0x232   : > { %v838_v50 = vpack.c.bf16 %v793_v47, %v790_v46  ;;  %v814_v58 = vadd.f32 %v1535_v49, %v1379_v33 }
 0x233   : > { %v805_v52 = vpop.f32.mrf.mxu1 }
 0x234   : > { %1561 = vmatprep.mubr.bf16.mxu0 %v838_v50  ;;  %v806_v56 = vadd.f32 %v1379_v33, %v805_v52 }
 0x235   : > { %v1536_v53 = vpop.f32.mrf.mxu1  ;;  %1562 = vmatmul.mubr.bf16.gmra.mxu0 %v839_v51 }
 0x236   : > { %v817_v54 = vadd.f32 %v1536_v53, %v1379_v33 }
 0x237   : > { %v808_v55 = vpop.f32.mrf.mxu1 }
 0x238   : > { %v809_v57 = vadd.f32 %v1379_v33, %v808_v55  ;;  %v841_v61 = vpack.c.bf16 %v817_v54, %v814_v58 }
 0x239   : > { %v1539_v59 = vpop.f32.mrf.mxu1 }
 0x23a   : > { %v840_v60 = vpack.c.bf16 %v809_v57, %v806_v56  ;;  %v830_v4 = vadd.f32 %v1539_v59, %v1379_v33 }
 0x23b   : > { %v821_v62 = vpop.f32.mrf.mxu1 }
 0x23c   : > { %1565 = vmatprep.mubr.bf16.mxu0 %v840_v60  ;;  %v822_v2 = vadd.f32 %v1379_v33, %v821_v62 }
 0x23d   : > { %v1540_v63 = vpop.f32.mrf.mxu1  ;;  %1566 = vmatmul.mubr.bf16.gmra.mxu0 %v841_v61 }
 0x23e   : > { %v833_v0 = vadd.f32 %v1540_v63, %v1379_v33 }
 0x23f   : > { %v824_v1 = vpop.f32.mrf.mxu1 }
 0x240   : > { %v825_v3 = vadd.f32 %v1379_v33, %v824_v1  ;;  %v843_v6 = vpack.c.bf16 %v833_v0, %v830_v4 }
 0x242   : > { %v842_v5 = vpack.c.bf16 %v825_v3, %v822_v2  ;;  %v1397_v3 = vld [vmem:[%s2275_s8] ss:$0 sm:$0xff] }
 0x244   : > { %1569 = vmatprep.mubr.bf16.mxu0 %v842_v5 }
 0x245   : > { %1570 = vmatmul.mubr.bf16.gmra.mxu0 %v843_v6 }
 0x2ed   : > { %v1559_v10 = vpop.f32.mrf.mxu0 }
 0x2ee   : > { %v958_v16 = vadd.f32 %v1559_v10, %v1388_v12 }
 0x2ef   : > { %v949_v11 = vpop.f32.mrf.mxu0 }
 0x2f0   : > { %v950_v14 = vadd.f32 %v1388_v12, %v949_v11  ;;  %v1014_v23 = vmax.f32 %v958_v16, 0.0 }
 0x2f1   : > { %v1560_v13 = vpop.f32.mrf.mxu0 }
 0x2f2   : > { %v961_v15 = vadd.f32 %v1560_v13, %v1388_v12  ;;  %v1012_v21 = vmax.f32 %v950_v14, 0.0 }
 0x2f3   : > { %v952_v17 = vpop.f32.mrf.mxu0 }
 0x2f4   : > { %v953_v18 = vadd.f32 %v1388_v12, %v952_v17  ;;  %v1015_v19 = vmax.f32 %v961_v15, 0.0 }
 0x2f5   : > { %v1563_v20 = vpop.f32.mrf.mxu0 }
 0x2f6   : > { %v1013_v22 = vmax.f32 %v953_v18, 0.0  ;;  %v1029_v26 = vpack.c.bf16 %v1015_v19, %v1014_v23  ;;  %v974_v30 = vadd.f32 %v1563_v20, %v1388_v12 }
 0x2f7   : > { %v965_v24 = vpop.f32.mrf.mxu0 }
 0x2f8   : > { %v1028_v25 = vpack.c.bf16 %v1013_v22, %v1012_v21  ;;  %v966_v28 = vadd.f32 %v1388_v12, %v965_v24  ;;  %v1018_v37 = vmax.f32 %v974_v30, 0.0 }
 0x2f9   : > { %v1564_v27 = vpop.f32.mrf.mxu0 }
 0x2fa   : > { %v977_v29 = vadd.f32 %v1564_v27, %v1388_v12  ;;  %1589 = vmatprep.mubr.bf16.mxu1 %v1028_v25  ;;  %v1016_v35 = vmax.f32 %v966_v28, 0.0 }
 0x2fb   : > { %v968_v31 = vpop.f32.mrf.mxu0  ;;  %1590 = vmatmul.mubr.bf16.vlgmr.msra.gmra.mxu1 %v1029_v26 }
 0x2fc   : > { %v969_v32 = vadd.f32 %v1388_v12, %v968_v31  ;;  %v1019_v33 = vmax.f32 %v977_v29, 0.0 }
 0x2fd   : > { %v1567_v34 = vpop.f32.mrf.mxu0 }
 0x2fe   : > { %v1017_v36 = vmax.f32 %v969_v32, 0.0  ;;  %v1031_v40 = vpack.c.bf16 %v1019_v33, %v1018_v37  ;;  %v990_v44 = vadd.f32 %v1567_v34, %v1388_v12 }
 0x2ff   : > { %v981_v38 = vpop.f32.mrf.mxu0 }
 0x300   : > { %v1030_v39 = vpack.c.bf16 %v1017_v36, %v1016_v35  ;;  %v982_v42 = vadd.f32 %v1388_v12, %v981_v38  ;;  %v1022_v51 = vmax.f32 %v990_v44, 0.0 }
 0x301   : > { %v1568_v41 = vpop.f32.mrf.mxu0 }
 0x302   : > { %v993_v43 = vadd.f32 %v1568_v41, %v1388_v12  ;;  %1593 = vmatprep.mubr.bf16.mxu1 %v1030_v39  ;;  %v1020_v49 = vmax.f32 %v982_v42, 0.0 }
 0x303   : > { %v984_v45 = vpop.f32.mrf.mxu0  ;;  %1594 = vmatmul.mubr.bf16.gmra.mxu1 %v1031_v40 }
 0x304   : > { %v985_v46 = vadd.f32 %v1388_v12, %v984_v45  ;;  %v1023_v47 = vmax.f32 %v993_v43, 0.0 }
 0x305   : > { %v1571_v48 = vpop.f32.mrf.mxu0 }
 0x306   : > { %v1021_v50 = vmax.f32 %v985_v46, 0.0  ;;  %v1033_v54 = vpack.c.bf16 %v1023_v47, %v1022_v51  ;;  %v1006_v58 = vadd.f32 %v1571_v48, %v1388_v12 }
 0x307   : > { %v997_v52 = vpop.f32.mrf.mxu0 }
 0x308   : > { %v1032_v53 = vpack.c.bf16 %v1021_v50, %v1020_v49  ;;  %v998_v56 = vadd.f32 %v1388_v12, %v997_v52  ;;  %v1026_v0 = vmax.f32 %v1006_v58, 0.0 }
 0x309   : > { %v1572_v55 = vpop.f32.mrf.mxu0 }
 0x30a   : > { %v1009_v57 = vadd.f32 %v1572_v55, %v1388_v12  ;;  %1597 = vmatprep.mubr.bf16.mxu1 %v1032_v53  ;;  %v1024_v62 = vmax.f32 %v998_v56, 0.0 }
 0x30b   : > { %v1000_v59 = vpop.f32.mrf.mxu0  ;;  %1598 = vmatmul.mubr.bf16.gmra.mxu1 %v1033_v54 }
 0x30c   : > { %v1001_v60 = vadd.f32 %v1388_v12, %v1000_v59  ;;  %v1027_v61 = vmax.f32 %v1009_v57, 0.0 }
 0x30e   : > { %v1025_v63 = vmax.f32 %v1001_v60, 0.0  ;;  %v1035_v2 = vpack.c.bf16 %v1027_v61, %v1026_v0 }
 0x310   : > { %v1034_v1 = vpack.c.bf16 %v1025_v63, %v1024_v62 }
 0x312   : > { %1601 = vmatprep.mubr.bf16.mxu1 %v1034_v1 }
 0x313   : > { %1602 = vmatmul.mubr.bf16.gmra.mxu1 %v1035_v2 }
 0x3bb   : > { %v1591_v4 = vpop.f32.mrf.mxu1 }
 0x3bc   : > { %v1150_v5 = vadd.f32 %v1591_v4, %v1397_v3 }
 0x3bd   : > { %v1141_v6 = vpop.f32.mrf.mxu1 }
 0x3be   : > { %1206 = vst [vmem:[%s2199_s1 + $0x10] sm:$0xff] %v1150_v5  ;;  %v1142_v7 = vadd.f32 %v1397_v3, %v1141_v6 }
 0x3bf   : > { %v1592_v8 = vpop.f32.mrf.mxu1 }
 0x3c0   : > { %1204 = vst [vmem:[%s2199_s1] sm:$0xff] %v1142_v7  ;;  %v1153_v9 = vadd.f32 %v1592_v8, %v1397_v3 }
 0x3c1   : > { %v1144_v10 = vpop.f32.mrf.mxu1 }
 0x3c2   : > { %1207 = vst [vmem:[%s2199_s1 + $0x18] sm:$0xff] %v1153_v9  ;;  %v1145_v11 = vadd.f32 %v1397_v3, %v1144_v10 }
 0x3c3   : > { %v1595_v12 = vpop.f32.mrf.mxu1 }
 0x3c4   : > { %1205 = vst [vmem:[%s2199_s1 + $0x8] sm:$0xff] %v1145_v11  ;;  %v1166_v13 = vadd.f32 %v1595_v12, %v1397_v3 }
 0x3c5   : > { %v1157_v14 = vpop.f32.mrf.mxu1 }
 0x3c6   : > { %1210 = vst [vmem:[%s2199_s1 + $0x30] sm:$0xff] %v1166_v13  ;;  %v1158_v15 = vadd.f32 %v1397_v3, %v1157_v14 }
 0x3c7   : > { %v1596_v16 = vpop.f32.mrf.mxu1 }
 0x3c8   : > { %1208 = vst [vmem:[%s2199_s1 + $0x20] sm:$0xff] %v1158_v15  ;;  %v1169_v17 = vadd.f32 %v1596_v16, %v1397_v3 }
 0x3c9   : > { %v1160_v18 = vpop.f32.mrf.mxu1 }
 0x3ca   : > { %1211 = vst [vmem:[%s2199_s1 + $0x38] sm:$0xff] %v1169_v17  ;;  %v1161_v19 = vadd.f32 %v1397_v3, %v1160_v18 }
 0x3cb   : > { %v1599_v20 = vpop.f32.mrf.mxu1 }
 0x3cc   : > { %1209 = vst [vmem:[%s2199_s1 + $0x28] sm:$0xff] %v1161_v19  ;;  %v1182_v21 = vadd.f32 %v1599_v20, %v1397_v3 }
 0x3cd   : > { %v1173_v22 = vpop.f32.mrf.mxu1 }
 0x3ce   : > { %1214 = vst [vmem:[%s2199_s1 + $0x50] sm:$0xff] %v1182_v21  ;;  %v1174_v23 = vadd.f32 %v1397_v3, %v1173_v22 }
 0x3cf   : > { %v1600_v24 = vpop.f32.mrf.mxu1 }
 0x3d0   : > { %1212 = vst [vmem:[%s2199_s1 + $0x40] sm:$0xff] %v1174_v23  ;;  %v1185_v25 = vadd.f32 %v1600_v24, %v1397_v3 }
 0x3d1   : > { %v1176_v26 = vpop.f32.mrf.mxu1 }
 0x3d2   : > { %1215 = vst [vmem:[%s2199_s1 + $0x58] sm:$0xff] %v1185_v25  ;;  %v1177_v27 = vadd.f32 %v1397_v3, %v1176_v26 }
 0x3d3   : > { %v1603_v28 = vpop.f32.mrf.mxu1 }
 0x3d4   : > { %1213 = vst [vmem:[%s2199_s1 + $0x48] sm:$0xff] %v1177_v27  ;;  %v1198_v29 = vadd.f32 %v1603_v28, %v1397_v3 }
 0x3d5   : > { %v1189_v30 = vpop.f32.mrf.mxu1 }
 0x3d6   : > { %1218 = vst [vmem:[%s2199_s1 + $0x70] sm:$0xff] %v1198_v29  ;;  %v1190_v31 = vadd.f32 %v1397_v3, %v1189_v30 }
 0x3d7   : > { %v1604_v32 = vpop.f32.mrf.mxu1 }
 0x3d8   : > { %1216 = vst [vmem:[%s2199_s1 + $0x60] sm:$0xff] %v1190_v31  ;;  %v1201_v33 = vadd.f32 %v1604_v32, %v1397_v3 }
 0x3d9   : > { %v1192_v34 = vpop.f32.mrf.mxu1 }
 0x3da   : > { %1219 = vst [vmem:[%s2199_s1 + $0x78] sm:$0xff] %v1201_v33  ;;  %v1193_v35 = vadd.f32 %v1397_v3, %v1192_v34 }
 0x3dc   : > { %1217 = vst [vmem:[%s2199_s1 + $0x68] sm:$0xff] %v1193_v35 }
 0x3dd   : > { %1881 = shalt.err (!%p1878_p5)
}
 0x3de   : > { %s1882_s20 = scalar_lea.hbm %s2220_s15, 2048  ;;  %s1886_s28 = scalar_lea.hbm %s2276_s9, 4096 }
 0x3df   : > { %p1883_p6 = scmp.ne.s32.totalorder %s2220_s15, %s1882_s20  ;;  %p1887_p9 = scmp.lt.s32.totalorder %s2220_s15, %s2276_s9 }
 0x3e0   : > { %p1888_p2 = scmp.lt.s32.totalorder %s1886_s28, %s1882_s20 }
 0x3e1   : > { %p1884_p4 = pnand %p1883_p6, %p2303_p12 }
 0x3e2   : > { %p1889_p3 = por %p1888_p2, %p1887_p9 }
 0x3e3   : > { %p1885_p8 = pneg %p1884_p4 }
 0x3e5   : > { %p1890_p10 = pnand %p1889_p3, %p1885_p8 }
 0x3e7   : > { %1893 = shalt.err (!%p1890_p10)
}
 0x3e8   : > { %s1950_s22 = smov 128   ;;  %s1951_s24 = smov 8  }
 0x3e9   : > { %1623 = dma.vmem_to_hbm [thread:$0]  (%p2303_p12), %s2222_s5, 2048, %s2220_s15, %s1221_s17, %s1950_s22, %s1950_s22, %s1951_s24  }
 0x3ea PF: > { %s1249_s13 = sand.u32 1, %s1928_s30   ;;  %p2304_p7 = scmp.ne.s32.totalorder %s2287_s16, 0 }
 0x3eb   : > { %p2305_p1 = scmp.ge.s32.totalorder %s1940_s12, 2  ;;  %s1250_s26 = scalar_lea.sflag [#allocation4], %s1249_s13 }
 0x3ed   : > { %p1643_p13 = pnand %p2305_p1, %p2304_p7 }
 0x3ef   : > { %p1644_p0 = pneg %p1643_p13 }
 0x3f1   : > { %1923 = dma.done.wait (%p1644_p0), %s1250_s26, 2048  }
 0x3f2   : > { %1925 = vsyncadd (%p1644_p0), %s1250_s26, 4294965248  ;;  %p24_p11 = scmp.ge.s32.totalorder %s2102_s18, 4   ;;  %s2306_s30 = smov %s1932_s10 }
 0x3f3   : > { %s2307_s10 = smov %s1936_s11  ;;  %s2308_s11 = smov %s2118_s23 }
 0x3f4   : > { %s2309_s12 = smov %s2102_s18  ;;  %26 = sbr.rel (!%p24_p11) target bundleno = 11 (0xb), region = 117 }
 0x3f9   :  { %1255 = vsyncpa [#allocation3], 1 }
 0x3fa   :  { %1257 = vsyncpa [#allocation3 + $0x1], 1 }
 0x3fb   :  { %1258 = vsyncpa [#allocation6], 1 }
 0x3fc   :  { %1259 = vsyncpa [#allocation9], 1 }
 0x3fd   :  { %1260 = vsyncpa [#allocation4], 1 }
 0x3fe   :  { %1262 = vsyncpa [#allocation4 + $0x1], 1 }

</bundles_post_ra>
